<compile_context>
chip_gen: v7x
topology: tpu7x:2x2x1
jax: 0.10.0
libtpu: 0.0.40
codegen_flags: <defaults>
</compile_context>

<pallas_src>
import jax
import jax.numpy as jnp
from jax.experimental import pallas as pl
from jax.experimental.pallas import tpu as pltpu


LANE = 128  # channel dims are padded to a multiple of the TPU lane width


# ------------------------------ fused kernel ------------------------------- #

def _make_kernel(t: int):
    """Fused autoencoder kernel for one batch block of `t` rows per phase.

    Every activation is a (t, C) or (2t, C) matrix with channels on lanes; the
    sequence axis is carried as 4 interleaved phases (position 4*row + r).
    Stride-2 convs / transposed convs become per-tap matmuls plus a
    "shift one row" operator (XLU roll + boundary-row mask).
    """

    def mm(a, w):
        # MXU matmul: bf16 operands, f32 accumulation.
        return jnp.dot(a.astype(w.dtype), w, preferred_element_type=jnp.float32)

    def shift_down(a):
        # result[i] = a[i-1]; row 0 <- 0   (previous sequence position)
        rows = jax.lax.broadcasted_iota(jnp.int32, a.shape, 0)
        return jnp.where(rows == 0, 0.0, pltpu.roll(a, 1, 0))

    def shift_up(a):
        # result[i] = a[i+1]; last row <- 0   (next sequence position)
        n = a.shape[0]
        rows = jax.lax.broadcasted_iota(jnp.int32, a.shape, 0)
        return jnp.where(rows == n - 1, 0.0, pltpu.roll(a, n - 1, 0))

    def kernel(x_ref, w1_ref, b1_ref, w2_ref, b2_ref,
               v_ref, c1_ref, u_ref, c2_ref, y_ref):
        b1 = b1_ref[...]
        b2 = b2_ref[...]
        c1 = c1_ref[...]
        c2 = c2_ref[...]
        # Input phases: x_ref[0, r][s, :] == x[b, :, 4s + r]  (channels-last).
        x0, x1, x2, x3 = x_ref[0, 0], x_ref[0, 1], x_ref[0, 2], x_ref[0, 3]

        # --- encoder 1: Conv1d(Cin -> 32, k=3, s=2, p=1) + ReLU      (L -> L/2)
        # h1[o] = relu(x[2o-1] W1_0 + x[2o] W1_1 + x[2o+1] W1_2 + b1)
        # even outputs o=2s stacked on top of odd outputs o=2s+1: 1 matmul/tap.
        a0 = jnp.concatenate([shift_down(x3), x1], axis=0)      # (2t, Cin_pad)
        a1 = jnp.concatenate([x0, x2], axis=0)
        a2 = jnp.concatenate([x1, x3], axis=0)
        h1 = jnp.maximum(
            mm(a0, w1_ref[0]) + mm(a1, w1_ref[1]) + mm(a2, w1_ref[2]) + b1, 0.0)
        h1e, h1o = h1[:t], h1[t:]                               # h1[2s], h1[2s+1]

        # --- encoder 2: Conv1d(32 -> latent, k=3, s=2, p=1) + ReLU (L/2 -> L/4)
        # h2[s] = relu(h1[2s-1] W2_0 + h1[2s] W2_1 + h1[2s+1] W2_2 + b2)
        h2 = jnp.maximum(
            mm(shift_down(h1o), w2_ref[0]) + mm(h1e, w2_ref[1])
            + mm(h1o, w2_ref[2]) + b2, 0.0)                     # (t, latent)

        # --- decoder 1: ConvTranspose1d(latent -> 32, k=4, s=2, p=1) + ReLU
        # polyphase: h3[2s] = h2[s] V1 + h2[s-1] V3 ; h3[2s+1] = h2[s+1] V0 + h2[s] V2
        h3e = jnp.maximum(mm(h2, v_ref[1]) + mm(shift_down(h2), v_ref[3]) + c1, 0.0)
        h3o = jnp.maximum(mm(shift_up(h2), v_ref[0]) + mm(h2, v_ref[2]) + c1, 0.0)

        # --- decoder 2: ConvTranspose1d(32 -> Cout, k=4, s=2, p=1) + Tanh
        # y[2m] = h3[m] U1 + h3[m-1] U3 ;  y[2m+1] = h3[m+1] U0 + h3[m] U2
        # Split m by parity -> 4 output phases; the two phases sharing a weight
        # tap are stacked along M, so dec2 is 4 matmuls of (2t, 32)@(32, Cout_pad).
        l_eo = jnp.concatenate([h3e, h3o], axis=0)                    # U1 / U2 LHS
        l_u3 = jnp.concatenate([shift_down(h3o), h3e], axis=0)        # U3 LHS
        l_u0 = jnp.concatenate([h3o, shift_up(h3e)], axis=0)          # U0 LHS
        y02 = jnp.tanh(mm(l_eo, u_ref[1]) + mm(l_u3, u_ref[3]) + c2)  # rows: [y0; y2]
        y13 = jnp.tanh(mm(l_u0, u_ref[0]) + mm(l_eo, u_ref[2]) + c2)  # rows: [y1; y3]

        y_ref[0, 0] = y02[:t].astype(y_ref.dtype)
        y_ref[0, 1] = y13[:t].astype(y_ref.dtype)
        y_ref[0, 2] = y02[t:].astype(y_ref.dtype)
        y_ref[0, 3] = y13[t:].astype(y_ref.dtype)

    return kernel


# -------------------------- one-time weight packing ------------------------- #

def _pad_to(n: int, m: int) -> int:
    return ((n + m - 1) // m) * m


def pack_params(params):
    """Repack PyTorch-layout weights into per-tap, lane-padded bf16 MXU operands.

    Conv1d weight (Cout, Cin, k)          -> (k, Cin_pad, Cout) tap stack.
    ConvTranspose1d weight (Cin, Cout, k) -> (k, Cin, Cout_pad) tap stack.
    Biases stay f32 (1, C) rows.  Runs once at init.
    """
    bf16, f32 = jnp.bfloat16, jnp.float32
    cin = params["enc1_w"].shape[1]
    cout = params["dec2_w"].shape[1]
    cin_pad, cout_pad = _pad_to(cin, LANE), _pad_to(cout, LANE)

    w1 = jnp.transpose(params["enc1_w"], (2, 1, 0))             # (3, Cin, 32)
    w1 = jnp.pad(w1, ((0, 0), (0, cin_pad - cin), (0, 0)))
    w2 = jnp.transpose(params["enc2_w"], (2, 1, 0))             # (3, 32, latent)
    v = jnp.transpose(params["dec1_w"], (2, 0, 1))              # (4, latent, 32)
    u = jnp.transpose(params["dec2_w"], (2, 0, 1))              # (4, 32, Cout)
    u = jnp.pad(u, ((0, 0), (0, 0), (0, cout_pad - cout)))
    c2 = jnp.pad(params["dec2_b"], (0, cout_pad - cout))

    return {
        "w1": w1.astype(bf16), "b1": params["enc1_b"].reshape(1, -1).astype(f32),
        "w2": w2.astype(bf16), "b2": params["enc2_b"].reshape(1, -1).astype(f32),
        "v":  v.astype(bf16),  "c1": params["dec1_b"].reshape(1, -1).astype(f32),
        "u":  u.astype(bf16),  "c2": c2.reshape(1, -1).astype(f32),
    }


# ------------------------------ forward wrapper ----------------------------- #

@jax.jit
def simple_conv_autoencoder(x, packed):
    """x: (N, C_in, L) float32 with L % 4 == 0.  Returns (N, C_in, L) in [-1, 1]."""
    nb, cin, length = x.shape
    if length % 4 != 0:
        raise ValueError("sequence length must be divisible by 4")
    t = length // 4
    cin_pad = packed["w1"].shape[1]
    cout_pad = packed["u"].shape[2]
    latent = packed["w2"].shape[2]

    # Boundary layout prep (single fused XLA pass over x): NCL -> channels-last,
    # zero-pad channels to the lane-padded width, split L into 4 phases.
    # TODO(synk): for very large batch*L, fold this transpose into the input
    # BlockSpec / accept channels-last input to avoid the extra HBM pass.
    x_nlc = jnp.transpose(x, (0, 2, 1)).astype(jnp.float32)          # (N, L, Cin)
    x_nlc = jnp.pad(x_nlc, ((0, 0), (0, 0), (0, cin_pad - cin)))
    x_ph = jnp.transpose(x_nlc.reshape(nb, t, 4, cin_pad), (0, 2, 1, 3))

    macs = nb * (3 * 2 * t * cin_pad * 32        # enc1: 3 taps, phases stacked on M
                 + 3 * t * 32 * latent           # enc2
                 + 4 * t * latent * 32           # dec1
                 + 4 * 2 * t * 32 * cout_pad)    # dec2: 4 taps, phases stacked on M
    w_bytes = sum(int(v.size) * v.dtype.itemsize for v in packed.values())
    cost = pl.CostEstimate(
        flops=2 * macs,
        transcendentals=nb * 4 * t * cout_pad,
        bytes_accessed=nb * 4 * t * (cin_pad + cout_pad) * 4 + w_bytes,
    )

    def resident(a):  # whole-array block, constant index map -> stays in VMEM
        return pl.BlockSpec(a.shape, lambda b, nd=a.ndim: (0,) * nd)

    y_ph = pl.pallas_call(
        _make_kernel(t),
        out_shape=jax.ShapeDtypeStruct((nb, 4, t, cout_pad), jnp.float32),
        grid=(nb,),
        in_specs=[pl.BlockSpec((1, 4, t, cin_pad), lambda b: (b, 0, 0, 0)),
                  resident(packed["w1"]), resident(packed["b1"]),
                  resident(packed["w2"]), resident(packed["b2"]),
                  resident(packed["v"]), resident(packed["c1"]),
                  resident(packed["u"]), resident(packed["c2"])],
        out_specs=pl.BlockSpec((1, 4, t, cout_pad), lambda b: (b, 0, 0, 0)),
        compiler_params=pltpu.CompilerParams(
            dimension_semantics=("parallel",),
            vmem_limit_bytes=32 * 1024 * 1024),
        cost_estimate=cost,
    )(x_ph, packed["w1"], packed["b1"], packed["w2"], packed["b2"],
      packed["v"], packed["c1"], packed["u"], packed["c2"])

    # Phases -> channels-last sequence -> NCL; drop the lane padding.
    y = jnp.transpose(y_ph, (0, 2, 1, 3)).reshape(nb, length, cout_pad)
    return jnp.transpose(y[:, :, :cin], (0, 2, 1))


# ------------------------- parameter init (PyTorch-like) -------------------- #

def init_params(key, input_channels=563, latent_channels=32):
    ks = jax.random.split(key, 8)

    def uni(k, shape, fan_in):
        bound = 1.0 / jnp.sqrt(float(fan_in))
        return jax.random.uniform(k, shape, jnp.float32, -bound, bound)

    return {
        # Conv1d weights: (C_out, C_in, k)
        "enc1_w": uni(ks[0], (32, input_channels, 3), input_channels * 3),
        "enc1_b": uni(ks[1], (32,), input_channels * 3),
        "enc2_w": uni(ks[2], (latent_channels, 32, 3), 32 * 3),
        "enc2_b": uni(ks[3], (latent_channels,), 32 * 3),
        # ConvTranspose1d weights: (C_in, C_out, k)  (torch layout)
        "dec1_w": uni(ks[4], (latent_channels, 32, 4), latent_channels * 4),
        "dec1_b": uni(ks[5], (32,), latent_channels * 4),
        "dec2_w": uni(ks[6], (32, input_channels, 4), 32 * 4),
        "dec2_b": uni(ks[7], (input_channels,), 32 * 4),
    }


# -------------------------- plain-JAX reference (check) --------------------- #

_HI = jax.lax.Precision.HIGHEST


def _ref_conv1d_k3s2p1(x, w, b):
    nb, cin, length = x.shape
    cout = w.shape[0]
    lout = (length + 2 - 3) // 2 + 1
    xp = jnp.pad(x, ((0, 0), (0, 0), (1, 1)))
    idx = jnp.arange(lout) * 2
    patches = jnp.stack([xp[:, :, idx + k] for k in range(3)], axis=-1)
    patches = jnp.transpose(patches, (0, 2, 1, 3)).reshape(nb * lout, cin * 3)
    out = jnp.dot(patches, w.reshape(cout, cin * 3).T, precision=_HI) + b[None, :]
    return jnp.transpose(out.reshape(nb, lout, cout), (0, 2, 1))


def _ref_convtranspose1d_k4s2p1(x, w, b):
    nb, cin, length = x.shape
    cout = w.shape[1]
    lout = 2 * length
    x_up = jnp.zeros((nb, cin, (length - 1) * 2 + 1), x.dtype).at[:, :, ::2].set(x)
    xp = jnp.pad(x_up, ((0, 0), (0, 0), (2, 2)))
    idx = jnp.arange(lout)
    patches = jnp.stack([xp[:, :, idx + k] for k in range(4)], axis=-1)
    patches = jnp.transpose(patches, (0, 2, 1, 3)).reshape(nb * lout, cin * 4)
    w_mat = jnp.transpose(w[:, :, ::-1], (0, 2, 1)).reshape(cin * 4, cout)
    out = jnp.dot(patches, w_mat, precision=_HI) + b[None, :]
    return jnp.transpose(out.reshape(nb, lout, cout), (0, 2, 1))


@jax.jit
def _reference_forward(x, params):
    h = jax.nn.relu(_ref_conv1d_k3s2p1(x, params["enc1_w"], params["enc1_b"]))
    h = jax.nn.relu(_ref_conv1d_k3s2p1(h, params["enc2_w"], params["enc2_b"]))
    h = jax.nn.relu(_ref_convtranspose1d_k4s2p1(h, params["dec1_w"], params["dec1_b"]))
    return jnp.tanh(_ref_convtranspose1d_k4s2p1(h, params["dec2_w"], params["dec2_b"]))


# ------------------------------------ main ---------------------------------- #

if __name__ == "__main__":
    key = jax.random.PRNGKey(0)
    kx, kp = jax.random.split(key)

    input_channels, latent_channels = 563, 32
    batch, length = 2, 32   # L % 4 == 0 so the autoencoder round-trips shape

    x = jax.random.normal(kx, (batch, input_channels, length), jnp.float32)
    params = init_params(kp, input_channels, latent_channels)
    packed = pack_params(params)          # weight repack / padding happens once

    y = simple_conv_autoencoder(x, packed)
    jax.block_until_ready(y)

    assert y.shape == (batch, input_channels, length), y.shape
    assert bool(jnp.all(jnp.isfinite(y)))
    assert bool(jnp.all(jnp.abs(y) <= 1.0 + 1e-6))   # tanh output range

    # Cross-check the fused polyphase kernel against a high-precision plain-JAX
    # reference of the PyTorch module (kernel uses bf16 MXU operands, f32 acc).
    y_ref = _reference_forward(x, params)
    err = float(jnp.max(jnp.abs(y - y_ref)))
    assert err < 5e-2, err

    print("KERNEL_OK")
</pallas_src>

<mosaic_0001>
module attributes {stable_mosaic.version = 11 : i64} {
  func.func @kernel(%arg0: i32, %arg1: memref<1x4x8x640xf32, #tpu.memory_space<vmem>>, %arg2: memref<3x640x32xbf16, #tpu.memory_space<vmem>>, %arg3: memref<1x32xf32, #tpu.memory_space<vmem>>, %arg4: memref<3x32x32xbf16, #tpu.memory_space<vmem>>, %arg5: memref<1x32xf32, #tpu.memory_space<vmem>>, %arg6: memref<4x32x32xbf16, #tpu.memory_space<vmem>>, %arg7: memref<1x32xf32, #tpu.memory_space<vmem>>, %arg8: memref<4x32x640xbf16, #tpu.memory_space<vmem>>, %arg9: memref<1x640xf32, #tpu.memory_space<vmem>>, %arg10: memref<1x4x8x640xf32, #tpu.memory_space<vmem>>) attributes {dimension_semantics = [#tpu.dimension_semantics<parallel>], iteration_bounds = array<i64: 2>, scalar_prefetch = 0 : i64, scratch_operands = 0 : i64, tpu.core_type = #tpu.core_type<tc>, window_params = [{transform_indices = @transform_0, window_bounds = array<i64: 1, 4, 8, 640>}, {pipeline_mode = #tpu.pipeline_mode<synchronous>, transform_indices = @transform_1, window_bounds = array<i64: 3, 640, 32>}, {pipeline_mode = #tpu.pipeline_mode<synchronous>, transform_indices = @transform_2, window_bounds = array<i64: 1, 32>}, {pipeline_mode = #tpu.pipeline_mode<synchronous>, transform_indices = @transform_3, window_bounds = array<i64: 3, 32, 32>}, {pipeline_mode = #tpu.pipeline_mode<synchronous>, transform_indices = @transform_4, window_bounds = array<i64: 1, 32>}, {pipeline_mode = #tpu.pipeline_mode<synchronous>, transform_indices = @transform_5, window_bounds = array<i64: 4, 32, 32>}, {pipeline_mode = #tpu.pipeline_mode<synchronous>, transform_indices = @transform_6, window_bounds = array<i64: 1, 32>}, {pipeline_mode = #tpu.pipeline_mode<synchronous>, transform_indices = @transform_7, window_bounds = array<i64: 4, 32, 640>}, {pipeline_mode = #tpu.pipeline_mode<synchronous>, transform_indices = @transform_8, window_bounds = array<i64: 1, 640>}, {transform_indices = @transform_9, window_bounds = array<i64: 1, 4, 8, 640>}]} {
    %c0 = arith.constant 0 : index
    %c0_0 = arith.constant 0 : index
    %0 = vector.load %arg3[%c0, %c0_0] : memref<1x32xf32, #tpu.memory_space<vmem>>, vector<1x32xf32>
    %c0_1 = arith.constant 0 : index
    %c0_2 = arith.constant 0 : index
    %1 = vector.load %arg5[%c0_1, %c0_2] : memref<1x32xf32, #tpu.memory_space<vmem>>, vector<1x32xf32>
    %c0_3 = arith.constant 0 : index
    %c0_4 = arith.constant 0 : index
    %2 = vector.load %arg7[%c0_3, %c0_4] : memref<1x32xf32, #tpu.memory_space<vmem>>, vector<1x32xf32>
    %c0_5 = arith.constant 0 : index
    %c0_6 = arith.constant 0 : index
    %3 = vector.load %arg9[%c0_5, %c0_6] : memref<1x640xf32, #tpu.memory_space<vmem>>, vector<1x640xf32>
    %c0_7 = arith.constant 0 : index
    %c0_8 = arith.constant 0 : index
    %c0_9 = arith.constant 0 : index
    %c0_10 = arith.constant 0 : index
    %4 = vector.load %arg1[%c0_7, %c0_8, %c0_9, %c0_10] : memref<1x4x8x640xf32, #tpu.memory_space<vmem>>, vector<1x1x8x640xf32>
    %5 = vector.shape_cast %4 : vector<1x1x8x640xf32> to vector<8x640xf32>
    %c0_11 = arith.constant 0 : index
    %c1 = arith.constant 1 : index
    %c0_12 = arith.constant 0 : index
    %c0_13 = arith.constant 0 : index
    %6 = vector.load %arg1[%c0_11, %c1, %c0_12, %c0_13] : memref<1x4x8x640xf32, #tpu.memory_space<vmem>>, vector<1x1x8x640xf32>
    %7 = vector.shape_cast %6 : vector<1x1x8x640xf32> to vector<8x640xf32>
    %c0_14 = arith.constant 0 : index
    %c2 = arith.constant 2 : index
    %c0_15 = arith.constant 0 : index
    %c0_16 = arith.constant 0 : index
    %8 = vector.load %arg1[%c0_14, %c2, %c0_15, %c0_16] : memref<1x4x8x640xf32, #tpu.memory_space<vmem>>, vector<1x1x8x640xf32>
    %9 = vector.shape_cast %8 : vector<1x1x8x640xf32> to vector<8x640xf32>
    %c0_17 = arith.constant 0 : index
    %c3 = arith.constant 3 : index
    %c0_18 = arith.constant 0 : index
    %c0_19 = arith.constant 0 : index
    %10 = vector.load %arg1[%c0_17, %c3, %c0_18, %c0_19] : memref<1x4x8x640xf32, #tpu.memory_space<vmem>>, vector<1x1x8x640xf32>
    %11 = vector.shape_cast %10 : vector<1x1x8x640xf32> to vector<8x640xf32>
    %12 = tpu.iota {dimensions = array<i32: 0>} : vector<8x640xi32>
    %c0_i32 = arith.constant 0 : i32
    %13 = vector.broadcast %c0_i32 : i32 to vector<8x640xi32>
    %14 = arith.cmpi eq, %12, %13 : vector<8x640xi32>
    %c1_i32 = arith.constant 1 : i32
    %15 = tpu.dynamic_rotate %11 by %c1_i32 dim 0 : vector<8x640xf32>, i32 -> vector<8x640xf32>
    %cst = arith.constant 0.000000e+00 : f32
    %16 = vector.broadcast %cst : f32 to vector<8x640xf32>
    %17 = arith.select %14, %16, %15 : vector<8x640xi1>, vector<8x640xf32>
    %18 = tpu.concatenate %17, %7 in 0 : vector<8x640xf32>, vector<8x640xf32> -> vector<16x640xf32>
    %19 = tpu.concatenate %5, %9 in 0 : vector<8x640xf32>, vector<8x640xf32> -> vector<16x640xf32>
    %20 = tpu.concatenate %7, %11 in 0 : vector<8x640xf32>, vector<8x640xf32> -> vector<16x640xf32>
    %c0_20 = arith.constant 0 : index
    %c0_21 = arith.constant 0 : index
    %c0_22 = arith.constant 0 : index
    %21 = vector.load %arg2[%c0_20, %c0_21, %c0_22] : memref<3x640x32xbf16, #tpu.memory_space<vmem>>, vector<1x640x32xbf16>
    %22 = vector.shape_cast %21 : vector<1x640x32xbf16> to vector<640x32xbf16>
    %23 = arith.truncf %18 : vector<16x640xf32> to vector<16x640xbf16>
    %cst_23 = arith.constant dense<0.000000e+00> : vector<16x32xf32>
    %24 = tpu.matmul %23, %22, %cst_23 {dimension_numbers = #tpu.dot_dimension_numbers<[1], [0], [0], [1], [0, 0, 1, 1], [], []>} : vector<16x640xbf16>, vector<640x32xbf16>, vector<16x32xf32> -> vector<16x32xf32>
    %c1_24 = arith.constant 1 : index
    %c0_25 = arith.constant 0 : index
    %c0_26 = arith.constant 0 : index
    %25 = vector.load %arg2[%c1_24, %c0_25, %c0_26] : memref<3x640x32xbf16, #tpu.memory_space<vmem>>, vector<1x640x32xbf16>
    %26 = vector.shape_cast %25 : vector<1x640x32xbf16> to vector<640x32xbf16>
    %27 = arith.truncf %19 : vector<16x640xf32> to vector<16x640xbf16>
    %cst_27 = arith.constant dense<0.000000e+00> : vector<16x32xf32>
    %28 = tpu.matmul %27, %26, %cst_27 {dimension_numbers = #tpu.dot_dimension_numbers<[1], [0], [0], [1], [0, 0, 1, 1], [], []>} : vector<16x640xbf16>, vector<640x32xbf16>, vector<16x32xf32> -> vector<16x32xf32>
    %29 = arith.addf %24, %28 : vector<16x32xf32>
    %c2_28 = arith.constant 2 : index
    %c0_29 = arith.constant 0 : index
    %c0_30 = arith.constant 0 : index
    %30 = vector.load %arg2[%c2_28, %c0_29, %c0_30] : memref<3x640x32xbf16, #tpu.memory_space<vmem>>, vector<1x640x32xbf16>
    %31 = vector.shape_cast %30 : vector<1x640x32xbf16> to vector<640x32xbf16>
    %32 = arith.truncf %20 : vector<16x640xf32> to vector<16x640xbf16>
    %cst_31 = arith.constant dense<0.000000e+00> : vector<16x32xf32>
    %33 = tpu.matmul %32, %31, %cst_31 {dimension_numbers = #tpu.dot_dimension_numbers<[1], [0], [0], [1], [0, 0, 1, 1], [], []>} : vector<16x640xbf16>, vector<640x32xbf16>, vector<16x32xf32> -> vector<16x32xf32>
    %34 = arith.addf %29, %33 : vector<16x32xf32>
    %35 = vector.broadcast %0 : vector<1x32xf32> to vector<16x32xf32>
    %36 = arith.addf %34, %35 : vector<16x32xf32>
    %cst_32 = arith.constant 0.000000e+00 : f32
    %37 = vector.broadcast %cst_32 : f32 to vector<16x32xf32>
    %38 = arith.maximumf %36, %37 : vector<16x32xf32>
    %39 = vector.extract_strided_slice %38 {offsets = [0, 0], sizes = [8, 32], strides = [1, 1]} : vector<16x32xf32> to vector<8x32xf32>
    %40 = vector.extract_strided_slice %38 {offsets = [8, 0], sizes = [8, 32], strides = [1, 1]} : vector<16x32xf32> to vector<8x32xf32>
    %41 = tpu.iota {dimensions = array<i32: 0>} : vector<8x32xi32>
    %c0_i32_33 = arith.constant 0 : i32
    %42 = vector.broadcast %c0_i32_33 : i32 to vector<8x32xi32>
    %43 = arith.cmpi eq, %41, %42 : vector<8x32xi32>
    %c1_i32_34 = arith.constant 1 : i32
    %44 = tpu.dynamic_rotate %40 by %c1_i32_34 dim 0 : vector<8x32xf32>, i32 -> vector<8x32xf32>
    %cst_35 = arith.constant 0.000000e+00 : f32
    %45 = vector.broadcast %cst_35 : f32 to vector<8x32xf32>
    %46 = arith.select %43, %45, %44 : vector<8x32xi1>, vector<8x32xf32>
    %c0_36 = arith.constant 0 : index
    %c0_37 = arith.constant 0 : index
    %c0_38 = arith.constant 0 : index
    %47 = vector.load %arg4[%c0_36, %c0_37, %c0_38] : memref<3x32x32xbf16, #tpu.memory_space<vmem>>, vector<1x32x32xbf16>
    %48 = vector.shape_cast %47 : vector<1x32x32xbf16> to vector<32x32xbf16>
    %49 = arith.truncf %46 : vector<8x32xf32> to vector<8x32xbf16>
    %cst_39 = arith.constant dense<0.000000e+00> : vector<8x32xf32>
    %50 = tpu.matmul %49, %48, %cst_39 {dimension_numbers = #tpu.dot_dimension_numbers<[1], [0], [0], [1], [0, 0, 1, 1], [], []>} : vector<8x32xbf16>, vector<32x32xbf16>, vector<8x32xf32> -> vector<8x32xf32>
    %c1_40 = arith.constant 1 : index
    %c0_41 = arith.constant 0 : index
    %c0_42 = arith.constant 0 : index
    %51 = vector.load %arg4[%c1_40, %c0_41, %c0_42] : memref<3x32x32xbf16, #tpu.memory_space<vmem>>, vector<1x32x32xbf16>
    %52 = vector.shape_cast %51 : vector<1x32x32xbf16> to vector<32x32xbf16>
    %53 = arith.truncf %39 : vector<8x32xf32> to vector<8x32xbf16>
    %cst_43 = arith.constant dense<0.000000e+00> : vector<8x32xf32>
    %54 = tpu.matmul %53, %52, %cst_43 {dimension_numbers = #tpu.dot_dimension_numbers<[1], [0], [0], [1], [0, 0, 1, 1], [], []>} : vector<8x32xbf16>, vector<32x32xbf16>, vector<8x32xf32> -> vector<8x32xf32>
    %55 = arith.addf %50, %54 : vector<8x32xf32>
    %c2_44 = arith.constant 2 : index
    %c0_45 = arith.constant 0 : index
    %c0_46 = arith.constant 0 : index
    %56 = vector.load %arg4[%c2_44, %c0_45, %c0_46] : memref<3x32x32xbf16, #tpu.memory_space<vmem>>, vector<1x32x32xbf16>
    %57 = vector.shape_cast %56 : vector<1x32x32xbf16> to vector<32x32xbf16>
    %58 = arith.truncf %40 : vector<8x32xf32> to vector<8x32xbf16>
    %cst_47 = arith.constant dense<0.000000e+00> : vector<8x32xf32>
    %59 = tpu.matmul %58, %57, %cst_47 {dimension_numbers = #tpu.dot_dimension_numbers<[1], [0], [0], [1], [0, 0, 1, 1], [], []>} : vector<8x32xbf16>, vector<32x32xbf16>, vector<8x32xf32> -> vector<8x32xf32>
    %60 = arith.addf %55, %59 : vector<8x32xf32>
    %61 = vector.broadcast %1 : vector<1x32xf32> to vector<8x32xf32>
    %62 = arith.addf %60, %61 : vector<8x32xf32>
    %cst_48 = arith.constant 0.000000e+00 : f32
    %63 = vector.broadcast %cst_48 : f32 to vector<8x32xf32>
    %64 = arith.maximumf %62, %63 : vector<8x32xf32>
    %c1_49 = arith.constant 1 : index
    %c0_50 = arith.constant 0 : index
    %c0_51 = arith.constant 0 : index
    %65 = vector.load %arg6[%c1_49, %c0_50, %c0_51] : memref<4x32x32xbf16, #tpu.memory_space<vmem>>, vector<1x32x32xbf16>
    %66 = vector.shape_cast %65 : vector<1x32x32xbf16> to vector<32x32xbf16>
    %67 = arith.truncf %64 : vector<8x32xf32> to vector<8x32xbf16>
    %cst_52 = arith.constant dense<0.000000e+00> : vector<8x32xf32>
    %68 = tpu.matmul %67, %66, %cst_52 {dimension_numbers = #tpu.dot_dimension_numbers<[1], [0], [0], [1], [0, 0, 1, 1], [], []>} : vector<8x32xbf16>, vector<32x32xbf16>, vector<8x32xf32> -> vector<8x32xf32>
    %69 = tpu.iota {dimensions = array<i32: 0>} : vector<8x32xi32>
    %c0_i32_53 = arith.constant 0 : i32
    %70 = vector.broadcast %c0_i32_53 : i32 to vector<8x32xi32>
    %71 = arith.cmpi eq, %69, %70 : vector<8x32xi32>
    %c1_i32_54 = arith.constant 1 : i32
    %72 = tpu.dynamic_rotate %64 by %c1_i32_54 dim 0 : vector<8x32xf32>, i32 -> vector<8x32xf32>
    %cst_55 = arith.constant 0.000000e+00 : f32
    %73 = vector.broadcast %cst_55 : f32 to vector<8x32xf32>
    %74 = arith.select %71, %73, %72 : vector<8x32xi1>, vector<8x32xf32>
    %c3_56 = arith.constant 3 : index
    %c0_57 = arith.constant 0 : index
    %c0_58 = arith.constant 0 : index
    %75 = vector.load %arg6[%c3_56, %c0_57, %c0_58] : memref<4x32x32xbf16, #tpu.memory_space<vmem>>, vector<1x32x32xbf16>
    %76 = vector.shape_cast %75 : vector<1x32x32xbf16> to vector<32x32xbf16>
    %77 = arith.truncf %74 : vector<8x32xf32> to vector<8x32xbf16>
    %cst_59 = arith.constant dense<0.000000e+00> : vector<8x32xf32>
    %78 = tpu.matmul %77, %76, %cst_59 {dimension_numbers = #tpu.dot_dimension_numbers<[1], [0], [0], [1], [0, 0, 1, 1], [], []>} : vector<8x32xbf16>, vector<32x32xbf16>, vector<8x32xf32> -> vector<8x32xf32>
    %79 = arith.addf %68, %78 : vector<8x32xf32>
    %80 = vector.broadcast %2 : vector<1x32xf32> to vector<8x32xf32>
    %81 = arith.addf %79, %80 : vector<8x32xf32>
    %cst_60 = arith.constant 0.000000e+00 : f32
    %82 = vector.broadcast %cst_60 : f32 to vector<8x32xf32>
    %83 = arith.maximumf %81, %82 : vector<8x32xf32>
    %84 = tpu.iota {dimensions = array<i32: 0>} : vector<8x32xi32>
    %c7_i32 = arith.constant 7 : i32
    %85 = vector.broadcast %c7_i32 : i32 to vector<8x32xi32>
    %86 = arith.cmpi eq, %84, %85 : vector<8x32xi32>
    %c7_i32_61 = arith.constant 7 : i32
    %87 = tpu.dynamic_rotate %64 by %c7_i32_61 dim 0 : vector<8x32xf32>, i32 -> vector<8x32xf32>
    %cst_62 = arith.constant 0.000000e+00 : f32
    %88 = vector.broadcast %cst_62 : f32 to vector<8x32xf32>
    %89 = arith.select %86, %88, %87 : vector<8x32xi1>, vector<8x32xf32>
    %c0_63 = arith.constant 0 : index
    %c0_64 = arith.constant 0 : index
    %c0_65 = arith.constant 0 : index
    %90 = vector.load %arg6[%c0_63, %c0_64, %c0_65] : memref<4x32x32xbf16, #tpu.memory_space<vmem>>, vector<1x32x32xbf16>
    %91 = vector.shape_cast %90 : vector<1x32x32xbf16> to vector<32x32xbf16>
    %92 = arith.truncf %89 : vector<8x32xf32> to vector<8x32xbf16>
    %cst_66 = arith.constant dense<0.000000e+00> : vector<8x32xf32>
    %93 = tpu.matmul %92, %91, %cst_66 {dimension_numbers = #tpu.dot_dimension_numbers<[1], [0], [0], [1], [0, 0, 1, 1], [], []>} : vector<8x32xbf16>, vector<32x32xbf16>, vector<8x32xf32> -> vector<8x32xf32>
    %c2_67 = arith.constant 2 : index
    %c0_68 = arith.constant 0 : index
    %c0_69 = arith.constant 0 : index
    %94 = vector.load %arg6[%c2_67, %c0_68, %c0_69] : memref<4x32x32xbf16, #tpu.memory_space<vmem>>, vector<1x32x32xbf16>
    %95 = vector.shape_cast %94 : vector<1x32x32xbf16> to vector<32x32xbf16>
    %96 = arith.truncf %64 : vector<8x32xf32> to vector<8x32xbf16>
    %cst_70 = arith.constant dense<0.000000e+00> : vector<8x32xf32>
    %97 = tpu.matmul %96, %95, %cst_70 {dimension_numbers = #tpu.dot_dimension_numbers<[1], [0], [0], [1], [0, 0, 1, 1], [], []>} : vector<8x32xbf16>, vector<32x32xbf16>, vector<8x32xf32> -> vector<8x32xf32>
    %98 = arith.addf %93, %97 : vector<8x32xf32>
    %99 = vector.broadcast %2 : vector<1x32xf32> to vector<8x32xf32>
    %100 = arith.addf %98, %99 : vector<8x32xf32>
    %cst_71 = arith.constant 0.000000e+00 : f32
    %101 = vector.broadcast %cst_71 : f32 to vector<8x32xf32>
    %102 = arith.maximumf %100, %101 : vector<8x32xf32>
    %103 = tpu.concatenate %83, %102 in 0 : vector<8x32xf32>, vector<8x32xf32> -> vector<16x32xf32>
    %104 = tpu.iota {dimensions = array<i32: 0>} : vector<8x32xi32>
    %c0_i32_72 = arith.constant 0 : i32
    %105 = vector.broadcast %c0_i32_72 : i32 to vector<8x32xi32>
    %106 = arith.cmpi eq, %104, %105 : vector<8x32xi32>
    %c1_i32_73 = arith.constant 1 : i32
    %107 = tpu.dynamic_rotate %102 by %c1_i32_73 dim 0 : vector<8x32xf32>, i32 -> vector<8x32xf32>
    %cst_74 = arith.constant 0.000000e+00 : f32
    %108 = vector.broadcast %cst_74 : f32 to vector<8x32xf32>
    %109 = arith.select %106, %108, %107 : vector<8x32xi1>, vector<8x32xf32>
    %110 = tpu.concatenate %109, %83 in 0 : vector<8x32xf32>, vector<8x32xf32> -> vector<16x32xf32>
    %111 = tpu.iota {dimensions = array<i32: 0>} : vector<8x32xi32>
    %c7_i32_75 = arith.constant 7 : i32
    %112 = vector.broadcast %c7_i32_75 : i32 to vector<8x32xi32>
    %113 = arith.cmpi eq, %111, %112 : vector<8x32xi32>
    %c7_i32_76 = arith.constant 7 : i32
    %114 = tpu.dynamic_rotate %83 by %c7_i32_76 dim 0 : vector<8x32xf32>, i32 -> vector<8x32xf32>
    %cst_77 = arith.constant 0.000000e+00 : f32
    %115 = vector.broadcast %cst_77 : f32 to vector<8x32xf32>
    %116 = arith.select %113, %115, %114 : vector<8x32xi1>, vector<8x32xf32>
    %117 = tpu.concatenate %102, %116 in 0 : vector<8x32xf32>, vector<8x32xf32> -> vector<16x32xf32>
    %c1_78 = arith.constant 1 : index
    %c0_79 = arith.constant 0 : index
    %c0_80 = arith.constant 0 : index
    %118 = vector.load %arg8[%c1_78, %c0_79, %c0_80] : memref<4x32x640xbf16, #tpu.memory_space<vmem>>, vector<1x32x640xbf16>
    %119 = vector.shape_cast %118 : vector<1x32x640xbf16> to vector<32x640xbf16>
    %120 = arith.truncf %103 : vector<16x32xf32> to vector<16x32xbf16>
    %cst_81 = arith.constant dense<0.000000e+00> : vector<16x640xf32>
    %121 = tpu.matmul %120, %119, %cst_81 {dimension_numbers = #tpu.dot_dimension_numbers<[1], [0], [0], [1], [0, 0, 1, 1], [], []>} : vector<16x32xbf16>, vector<32x640xbf16>, vector<16x640xf32> -> vector<16x640xf32>
    %c3_82 = arith.constant 3 : index
    %c0_83 = arith.constant 0 : index
    %c0_84 = arith.constant 0 : index
    %122 = vector.load %arg8[%c3_82, %c0_83, %c0_84] : memref<4x32x640xbf16, #tpu.memory_space<vmem>>, vector<1x32x640xbf16>
    %123 = vector.shape_cast %122 : vector<1x32x640xbf16> to vector<32x640xbf16>
    %124 = arith.truncf %110 : vector<16x32xf32> to vector<16x32xbf16>
    %cst_85 = arith.constant dense<0.000000e+00> : vector<16x640xf32>
    %125 = tpu.matmul %124, %123, %cst_85 {dimension_numbers = #tpu.dot_dimension_numbers<[1], [0], [0], [1], [0, 0, 1, 1], [], []>} : vector<16x32xbf16>, vector<32x640xbf16>, vector<16x640xf32> -> vector<16x640xf32>
    %126 = arith.addf %121, %125 : vector<16x640xf32>
    %127 = vector.broadcast %3 : vector<1x640xf32> to vector<16x640xf32>
    %128 = arith.addf %126, %127 : vector<16x640xf32>
    %129 = math.tanh %128 : vector<16x640xf32>
    %c0_86 = arith.constant 0 : index
    %c0_87 = arith.constant 0 : index
    %c0_88 = arith.constant 0 : index
    %130 = vector.load %arg8[%c0_86, %c0_87, %c0_88] : memref<4x32x640xbf16, #tpu.memory_space<vmem>>, vector<1x32x640xbf16>
    %131 = vector.shape_cast %130 : vector<1x32x640xbf16> to vector<32x640xbf16>
    %132 = arith.truncf %117 : vector<16x32xf32> to vector<16x32xbf16>
    %cst_89 = arith.constant dense<0.000000e+00> : vector<16x640xf32>
    %133 = tpu.matmul %132, %131, %cst_89 {dimension_numbers = #tpu.dot_dimension_numbers<[1], [0], [0], [1], [0, 0, 1, 1], [], []>} : vector<16x32xbf16>, vector<32x640xbf16>, vector<16x640xf32> -> vector<16x640xf32>
    %c2_90 = arith.constant 2 : index
    %c0_91 = arith.constant 0 : index
    %c0_92 = arith.constant 0 : index
    %134 = vector.load %arg8[%c2_90, %c0_91, %c0_92] : memref<4x32x640xbf16, #tpu.memory_space<vmem>>, vector<1x32x640xbf16>
    %135 = vector.shape_cast %134 : vector<1x32x640xbf16> to vector<32x640xbf16>
    %136 = arith.truncf %103 : vector<16x32xf32> to vector<16x32xbf16>
    %cst_93 = arith.constant dense<0.000000e+00> : vector<16x640xf32>
    %137 = tpu.matmul %136, %135, %cst_93 {dimension_numbers = #tpu.dot_dimension_numbers<[1], [0], [0], [1], [0, 0, 1, 1], [], []>} : vector<16x32xbf16>, vector<32x640xbf16>, vector<16x640xf32> -> vector<16x640xf32>
    %138 = arith.addf %133, %137 : vector<16x640xf32>
    %139 = vector.broadcast %3 : vector<1x640xf32> to vector<16x640xf32>
    %140 = arith.addf %138, %139 : vector<16x640xf32>
    %141 = math.tanh %140 : vector<16x640xf32>
    %142 = vector.extract_strided_slice %129 {offsets = [0, 0], sizes = [8, 640], strides = [1, 1]} : vector<16x640xf32> to vector<8x640xf32>
    %c0_94 = arith.constant 0 : index
    %c0_95 = arith.constant 0 : index
    %c0_96 = arith.constant 0 : index
    %c0_97 = arith.constant 0 : index
    %143 = vector.load %arg10[%c0_94, %c0_95, %c0_96, %c0_97] : memref<1x4x8x640xf32, #tpu.memory_space<vmem>>, vector<1x1x8x640xf32>
    %144 = vector.shape_cast %143 : vector<1x1x8x640xf32> to vector<8x640xf32>
    %145 = vector.shape_cast %142 : vector<8x640xf32> to vector<1x1x8x640xf32>
    tpu.vector_store %arg10[%c0_94, %c0_95, %c0_96, %c0_97], %145 {strides = array<i32>} : memref<1x4x8x640xf32, #tpu.memory_space<vmem>>, vector<1x1x8x640xf32>,
    %146 = vector.extract_strided_slice %141 {offsets = [0, 0], sizes = [8, 640], strides = [1, 1]} : vector<16x640xf32> to vector<8x640xf32>
    %c0_98 = arith.constant 0 : index
    %c1_99 = arith.constant 1 : index
    %c0_100 = arith.constant 0 : index
    %c0_101 = arith.constant 0 : index
    %147 = vector.load %arg10[%c0_98, %c1_99, %c0_100, %c0_101] : memref<1x4x8x640xf32, #tpu.memory_space<vmem>>, vector<1x1x8x640xf32>
    %148 = vector.shape_cast %147 : vector<1x1x8x640xf32> to vector<8x640xf32>
    %149 = vector.shape_cast %146 : vector<8x640xf32> to vector<1x1x8x640xf32>
    tpu.vector_store %arg10[%c0_98, %c1_99, %c0_100, %c0_101], %149 {strides = array<i32>} : memref<1x4x8x640xf32, #tpu.memory_space<vmem>>, vector<1x1x8x640xf32>,
    %150 = vector.extract_strided_slice %129 {offsets = [8, 0], sizes = [8, 640], strides = [1, 1]} : vector<16x640xf32> to vector<8x640xf32>
    %c0_102 = arith.constant 0 : index
    %c2_103 = arith.constant 2 : index
    %c0_104 = arith.constant 0 : index
    %c0_105 = arith.constant 0 : index
    %151 = vector.load %arg10[%c0_102, %c2_103, %c0_104, %c0_105] : memref<1x4x8x640xf32, #tpu.memory_space<vmem>>, vector<1x1x8x640xf32>
    %152 = vector.shape_cast %151 : vector<1x1x8x640xf32> to vector<8x640xf32>
    %153 = vector.shape_cast %150 : vector<8x640xf32> to vector<1x1x8x640xf32>
    tpu.vector_store %arg10[%c0_102, %c2_103, %c0_104, %c0_105], %153 {strides = array<i32>} : memref<1x4x8x640xf32, #tpu.memory_space<vmem>>, vector<1x1x8x640xf32>,
    %154 = vector.extract_strided_slice %141 {offsets = [8, 0], sizes = [8, 640], strides = [1, 1]} : vector<16x640xf32> to vector<8x640xf32>
    %c0_106 = arith.constant 0 : index
    %c3_107 = arith.constant 3 : index
    %c0_108 = arith.constant 0 : index
    %c0_109 = arith.constant 0 : index
    %155 = vector.load %arg10[%c0_106, %c3_107, %c0_108, %c0_109] : memref<1x4x8x640xf32, #tpu.memory_space<vmem>>, vector<1x1x8x640xf32>
    %156 = vector.shape_cast %155 : vector<1x1x8x640xf32> to vector<8x640xf32>
    %157 = vector.shape_cast %154 : vector<8x640xf32> to vector<1x1x8x640xf32>
    tpu.vector_store %arg10[%c0_106, %c3_107, %c0_108, %c0_109], %157 {strides = array<i32>} : memref<1x4x8x640xf32, #tpu.memory_space<vmem>>, vector<1x1x8x640xf32>,
    return
  }
  func.func @transform_0(%arg0: i32) -> (i32, i32, i32, i32) {
    %c0_i32 = arith.constant 0 : i32
    %c0_i32_0 = arith.constant 0 : i32
    %c0_i32_1 = arith.constant 0 : i32
    %c0_i32_2 = arith.constant 0 : i32
    return %arg0, %c0_i32, %c0_i32_0, %c0_i32_1 : i32, i32, i32, i32
  }
  func.func @transform_1(%arg0: i32) -> (i32, i32, i32) {
    %c0_i32 = arith.constant 0 : i32
    %c0_i32_0 = arith.constant 0 : i32
    %c0_i32_1 = arith.constant 0 : i32
    %c0_i32_2 = arith.constant 0 : i32
    return %c0_i32, %c0_i32_0, %c0_i32_1 : i32, i32, i32
  }
  func.func @transform_2(%arg0: i32) -> (i32, i32) {
    %c0_i32 = arith.constant 0 : i32
    %c0_i32_0 = arith.constant 0 : i32
    %c0_i32_1 = arith.constant 0 : i32
    return %c0_i32, %c0_i32_0 : i32, i32
  }
  func.func @transform_3(%arg0: i32) -> (i32, i32, i32) {
    %c0_i32 = arith.constant 0 : i32
    %c0_i32_0 = arith.constant 0 : i32
    %c0_i32_1 = arith.constant 0 : i32
    %c0_i32_2 = arith.constant 0 : i32
    return %c0_i32, %c0_i32_0, %c0_i32_1 : i32, i32, i32
  }
  func.func @transform_4(%arg0: i32) -> (i32, i32) {
    %c0_i32 = arith.constant 0 : i32
    %c0_i32_0 = arith.constant 0 : i32
    %c0_i32_1 = arith.constant 0 : i32
    return %c0_i32, %c0_i32_0 : i32, i32
  }
  func.func @transform_5(%arg0: i32) -> (i32, i32, i32) {
    %c0_i32 = arith.constant 0 : i32
    %c0_i32_0 = arith.constant 0 : i32
    %c0_i32_1 = arith.constant 0 : i32
    %c0_i32_2 = arith.constant 0 : i32
    return %c0_i32, %c0_i32_0, %c0_i32_1 : i32, i32, i32
  }
  func.func @transform_6(%arg0: i32) -> (i32, i32) {
    %c0_i32 = arith.constant 0 : i32
    %c0_i32_0 = arith.constant 0 : i32
    %c0_i32_1 = arith.constant 0 : i32
    return %c0_i32, %c0_i32_0 : i32, i32
  }
  func.func @transform_7(%arg0: i32) -> (i32, i32, i32) {
    %c0_i32 = arith.constant 0 : i32
    %c0_i32_0 = arith.constant 0 : i32
    %c0_i32_1 = arith.constant 0 : i32
    %c0_i32_2 = arith.constant 0 : i32
    return %c0_i32, %c0_i32_0, %c0_i32_1 : i32, i32, i32
  }
  func.func @transform_8(%arg0: i32) -> (i32, i32) {
    %c0_i32 = arith.constant 0 : i32
    %c0_i32_0 = arith.constant 0 : i32
    %c0_i32_1 = arith.constant 0 : i32
    return %c0_i32, %c0_i32_0 : i32, i32
  }
  func.func @transform_9(%arg0: i32) -> (i32, i32, i32, i32) {
    %c0_i32 = arith.constant 0 : i32
    %c0_i32_0 = arith.constant 0 : i32
    %c0_i32_1 = arith.constant 0 : i32
    %c0_i32_2 = arith.constant 0 : i32
    return %arg0, %c0_i32, %c0_i32_0, %c0_i32_1 : i32, i32, i32, i32
  }
}

</mosaic_0001>

<bundles_post_ra>
// kernel: simple_conv_autoencoder.1
= control target key start
LH: loop header
LB: loop body
LE: loop exit
PB: predicated region body
PF: predicated region fallthrough
CT: control target
= control target key end

     0   :  { %s4239_s30 = smov 0   ;;  %s5059_s0 = inlined_call_operand.vmem [shape: f32[2,4,8,640], index: 0, kind: input, shape index: {}]   ;;  %s5060_s1 = inlined_call_operand.vmem [shape: bf16[3,640,32], index: 1, kind: input, shape index: {}]   ;;  %s5061_s2 = inlined_call_operand.vmem [shape: f32[1,32], index: 2, kind: input, shape index: {}]   ;;  %s5062_s3 = inlined_call_operand.vmem [shape: bf16[3,32,32], index: 3, kind: input, shape index: {}]   ;;  %s5063_s4 = inlined_call_operand.vmem [shape: f32[1,32], index: 4, kind: input, shape index: {}]   ;;  %s5064_s5 = inlined_call_operand.vmem [shape: bf16[4,32,32], index: 5, kind: input, shape index: {}]   ;;  %s5065_s6 = inlined_call_operand.vmem [shape: f32[1,32], index: 6, kind: input, shape index: {}]   ;;  %s5066_s7 = inlined_call_operand.vmem [shape: bf16[4,32,640], index: 7, kind: input, shape index: {}]   ;;  %s5067_s8 = inlined_call_operand.vmem [shape: f32[1,640], index: 8, kind: input, shape index: {}]   ;;  %s5068_s9 = inlined_call_operand.vmem [shape: f32[2,4,8,640], index: 9, kind: output, shape index: {}]  }
   0x1 LB: > { %s3107_s10 = sadd.s32 4294967295, %s4183_s30   ;;  %p3111_p0 = scmp.ge.s32.totalorder %s4183_s30, 1  ;;  %s4183_s30 = sphi %s4239_s30, %s19_s30  }
   0x2   : > { %p287_p1 = scmp.lt.s32.totalorder %s4183_s30, 3 }
   0x4   : > { %p288_p2 = pnand %p3111_p0, %p287_p1 }
   0x5   : > { %v3947_v0 = vld [vmem:[%s5060_s1 + $0x180] sm:$0xff] (!%p288_p2)   ;;  %v3951_v4 = vld [vmem:[%s5060_s1 + $0x188] sm:$0xff] (!%p288_p2)   ;;  %v3955_v8 = vld [vmem:[%s5060_s1 + $0x190] sm:$0xff] (!%p288_p2)   ;;  %p323_p3 = scmp.lt.s32.totalorder (!%p288_p2), %s3107_s10, 1  ;;  %v4185_v39 = vmov (!%p288_p2), 0.0   ;;  %vm4186_vm0 = vmmov (!%p288_p2), 0   ;;  %v361_v58 = vlaneseq (!%p288_p2) }
   0x6   : > { %291 = sbr.rel (%p288_p2) target bundleno = 1137 (0x471), region = 56  ;;  %v3948_v1 = vld [vmem:[%s5060_s1 + $0x200] sm:$0xff] (!%p288_p2)   ;;  %3578 = vmatprep.subr.bf16.mxu0 (!%p288_p2), %v3947_v0  ;;  %v3952_v5 = vld [vmem:[%s5060_s1 + $0x208] sm:$0xff] (!%p288_p2)   ;;  %v3956_v9 = vld [vmem:[%s5060_s1 + $0x210] sm:$0xff] (!%p288_p2)   ;;  %vm4187_vm3 = vmmov (!%p288_p2), 1   ;;  %vm1757_vm5 = vcmask (!%p288_p2), 261120  }
   0x7   : > { %v3949_v2 = vld [vmem:[%s5060_s1 + $0x140] sm:$0xff] (!%p288_p2)   ;;  %3600 = vmatprep.subr.bf16.mxu1 (!%p288_p2), %v3948_v1  ;;  %v3953_v6 = vld [vmem:[%s5060_s1 + $0x148] sm:$0xff] (!%p288_p2)   ;;  %v3957_v10 = vld [vmem:[%s5060_s1 + $0x150] sm:$0xff] (!%p288_p2)   ;;  %v4420_v62 = vshrl.u32 (!%p288_p2), %v361_v58, 7 }
   0x8   : > { %v3950_v3 = vld [vmem:[%s5060_s1 + $0x1c0] sm:$0xff] (!%p288_p2)   ;;  %3579 = vmatpush3.bf16.msra.mxu0 (!%p288_p2), %v3949_v2  ;;  %v3954_v7 = vld [vmem:[%s5060_s1 + $0x1c8] sm:$0xff] (!%p288_p2)   ;;  %v3958_v11 = vld [vmem:[%s5060_s1 + $0x1d0] sm:$0xff] (!%p288_p2)  }
   0x9   : > { %3601 = vmatpush3.bf16.msra.mxu1 (!%p288_p2), %v3950_v3  ;;  %3580 = vmatprep.subr.bf16.mxu0 (!%p288_p2), %v3951_v4  ;;  %v3959_v12 = vld [vmem:[%s5060_s1 + $0x198] sm:$0xff] (!%p288_p2)   ;;  %v3963_v16 = vld [vmem:[%s5060_s1 + $0x1a0] sm:$0xff] (!%p288_p2)   ;;  %v3967_v20 = vld [vmem:[%s5060_s1 + $0x1a8] sm:$0xff] (!%p288_p2)   ;;  %vm363_vm1 = vcmp.eq.s32.totalorder (!%p288_p2), %v4420_v62, 0  ;;  %vm2058_vm6 = vcmp.eq.s32.totalorder (!%p288_p2), %v4420_v62, 7 }
   0xa   : > { %3602 = vmatprep.subr.bf16.mxu1 (!%p288_p2), %v3952_v5  ;;  %v3960_v13 = vld [vmem:[%s5060_s1 + $0x218] sm:$0xff] (!%p288_p2)   ;;  %v3964_v17 = vld [vmem:[%s5060_s1 + $0x220] sm:$0xff] (!%p288_p2)   ;;  %v3968_v21 = vld [vmem:[%s5060_s1 + $0x228] sm:$0xff] (!%p288_p2)  }
   0xb   : > { %v3961_v14 = vld [vmem:[%s5060_s1 + $0x158] sm:$0xff] (!%p288_p2)   ;;  %v3965_v18 = vld [vmem:[%s5060_s1 + $0x160] sm:$0xff] (!%p288_p2)   ;;  %v3969_v22 = vld [vmem:[%s5060_s1 + $0x168] sm:$0xff] (!%p288_p2)  }
   0xc   : > { %3581 = vmatpush3.bf16.msra.mxu0 (!%p288_p2), %v3953_v6  ;;  %v3962_v15 = vld [vmem:[%s5060_s1 + $0x1d8] sm:$0xff] (!%p288_p2)   ;;  %v3966_v19 = vld [vmem:[%s5060_s1 + $0x1e0] sm:$0xff] (!%p288_p2)   ;;  %v3970_v23 = vld [vmem:[%s5060_s1 + $0x1e8] sm:$0xff] (!%p288_p2)  }
   0xd   : > { %3603 = vmatpush3.bf16.msra.mxu1 %v3954_v7  ;;  %3582 = vmatprep.subr.bf16.mxu0 %v3955_v8  ;;  %s5072_s10 = smov (!%p323_p3, %s3107_s10), 1  ;;  %v3971_v24 = vld [vmem:[%s5060_s1 + $0x1b0] sm:$0xff]   ;;  %v3975_v28 = vld [vmem:[%s5060_s1 + $0x1b8] sm:$0xff]   ;;  %v3979_v45 = vld [vmem:[%s5060_s1 + $0x40] sm:$0xff]  }
   0xe   : > { %3604 = vmatprep.subr.bf16.mxu1 %v3956_v9  ;;  %v3972_v25 = vld [vmem:[%s5060_s1 + $0x230] sm:$0xff]   ;;  %s3934_s25 = smul.u32 160, %s5072_s10  ;;  %v3976_v29 = vld [vmem:[%s5060_s1 + $0x238] sm:$0xff]   ;;  %v3980_v46 = vld [vmem:[%s5060_s1 + $0x240] sm:$0xff]  }
   0xf   : > { %v3973_v26 = vld [vmem:[%s5060_s1 + $0x170] sm:$0xff]   ;;  %v3977_v30 = vld [vmem:[%s5060_s1 + $0x178] sm:$0xff]   ;;  %v3981_v47 = vld [vmem:[%s5060_s1] sm:$0xff]  }
  0x10   : > { %3583 = vmatpush3.bf16.msra.mxu0 %v3957_v10  ;;  %v3974_v27 = vld [vmem:[%s5060_s1 + $0x1f0] sm:$0xff]   ;;  %s4349_s17 = scalar_lea.vmem %s5059_s0, %s3934_s25  ;;  %v3978_v31 = vld [vmem:[%s5060_s1 + $0x1f8] sm:$0xff]   ;;  %v3982_v48 = vld [vmem:[%s5060_s1 + $0x48] sm:$0xff]   ;;  %s5022_s15 = scalar_lea.vmem %s5068_s9, %s3934_s25 }
  0x11   : > { %3605 = vmatpush3.bf16.msra.mxu1 %v3958_v11  ;;  %3584 = vmatprep.subr.bf16.mxu0 %v3959_v12  ;;  %v339_v32 = vld [vmem:[%s4349_s17 + $0x8] sm:$0xff]  ;;  %v3120_v33 = vld [vmem:[%s4349_s17 + $0x58] sm:$0xff]  ;;  %v338_v37 = vld [vmem:[%s4349_s17] sm:$0xff] }
  0x12   : > { %3606 = vmatprep.subr.bf16.mxu1 %v3960_v13  ;;  %v341_v34 = vld [vmem:[%s4349_s17 + $0x18] sm:$0xff]  ;;  %v541_v35 = vpack.c.bf16 %v3120_v33, %v339_v32  ;;  %v3122_v36 = vld [vmem:[%s4349_s17 + $0x68] sm:$0xff]  ;;  %v3119_v38 = vld [vmem:[%s4349_s17 + $0x50] sm:$0xff] }
  0x13   : > { %v543_v40 = vpack.c.bf16 %v3122_v36, %v341_v34  ;;  %v540_v41 = vpack.c.bf16 %v3119_v38, %v338_v37  ;;  %v340_v42 = vld [vmem:[%s4349_s17 + $0x10] sm:$0xff]  ;;  %v3121_v43 = vld [vmem:[%s4349_s17 + $0x60] sm:$0xff]  ;;  %v3983_v49 = vld [vmem:[%s5060_s1 + $0x248] sm:$0xff]  }
  0x14   : > { %3585 = vmatpush3.bf16.msra.mxu0 %v3961_v14  ;;  %817 = vmatprep.mubr.bf16.mxu0 %v541_v35  ;;  %v542_v44 = vpack.c.bf16 %v3121_v43, %v340_v42  ;;  %v3984_v50 = vld [vmem:[%s5060_s1 + $0x8] sm:$0xff]   ;;  %v3985_v51 = vld [vmem:[%s5060_s1 + $0x50] sm:$0xff]   ;;  %v3988_v54 = vld [vmem:[%s5060_s1 + $0x58] sm:$0xff]  }
  0x15   : > { %3607 = vmatpush3.bf16.msra.mxu1 %v3962_v15  ;;  %3586 = vmatprep.subr.bf16.mxu0 %v3963_v16  ;;  %v3986_v52 = vld [vmem:[%s5060_s1 + $0x250] sm:$0xff]   ;;  %v3989_v55 = vld [vmem:[%s5060_s1 + $0x258] sm:$0xff]   ;;  %v3991_v57 = vld [vmem:[%s5060_s1 + $0x60] sm:$0xff]  }
  0x16   : > { %3608 = vmatprep.subr.bf16.mxu1 %v3964_v17  ;;  %858 = vmatprep.mubr.bf16.mxu1 %v543_v40  ;;  %v3987_v53 = vld [vmem:[%s5060_s1 + $0x10] sm:$0xff]   ;;  %v3990_v56 = vld [vmem:[%s5060_s1 + $0x18] sm:$0xff]   ;;  %v3992_v59 = vld [vmem:[%s5060_s1 + $0x260] sm:$0xff]  }
  0x17   : > { %v3993_v60 = vld [vmem:[%s5060_s1 + $0x20] sm:$0xff]   ;;  %v3994_v61 = vld [vmem:[%s5060_s1 + $0x68] sm:$0xff]   ;;  %v3997_v1 = vld [vmem:[%s5060_s1 + $0x70] sm:$0xff]  }
  0x18   : > { %3587 = vmatpush3.bf16.msra.mxu0 %v3965_v18  ;;  %v3995_v63 = vld [vmem:[%s5060_s1 + $0x268] sm:$0xff]   ;;  %v3998_v2 = vld [vmem:[%s5060_s1 + $0x270] sm:$0xff]   ;;  %v4000_v4 = vld [vmem:[%s5060_s1 + $0x78] sm:$0xff]  }
  0x19   : > { %3609 = vmatpush3.bf16.msra.mxu1 %v3966_v19  ;;  %3588 = vmatprep.subr.bf16.mxu0 %v3967_v20  ;;  %v3996_v0 = vld [vmem:[%s5060_s1 + $0x28] sm:$0xff]   ;;  %v3999_v3 = vld [vmem:[%s5060_s1 + $0x30] sm:$0xff]   ;;  %v4447_v6 = vld [vmem:[%s4349_s17 + $0x80] sm:$0xff] }
  0x1a   : > { %3610 = vmatprep.subr.bf16.mxu1 %v3968_v21  ;;  %v4444_v5 = vld [vmem:[%s4349_s17 + $0x30] sm:$0xff]  ;;  %vm3289_vm2 = vmneg %vm363_vm1  ;;  %v4001_v7 = vld [vmem:[%s5060_s1 + $0x278] sm:$0xff]   ;;  %v365_v8 = vrot.slane %v4447_v6, 7 }
  0x1b   : > { %vm4455_vm4 = vmpackc.low %vm4187_vm3, %vm3289_vm2  ;;  %v342_v10 = vld [vmem:[%s4349_s17 + $0x20] sm:$0xff]  ;;  %v3123_v11 = vld [vmem:[%s4349_s17 + $0x70] sm:$0xff] }
  0x1c   : > { %3589 = vmatpush3.bf16.msra.mxu0 %v3969_v22  ;;  %v4002_v12 = vld [vmem:[%s5060_s1 + $0x38] sm:$0xff]   ;;  %v3291_v14 = vpack.c.bf16 %v4444_v5, %v365_v8  ;;  %v4469_v15 = vld [vmem:[%s4349_s17 + $0x28] sm:$0xff]  ;;  %v4003_v17 = vld [vmem:[%s5060_s1 + $0xc0] sm:$0xff]   ;;  %v544_v18 = vpack.c.bf16 %v3123_v11, %v342_v10 }
  0x1d   : > { %3611 = vmatpush3.bf16.msra.mxu1 %v3970_v23  ;;  %3590 = vmatprep.subr.bf16.mxu0 %v3971_v24  ;;  %v4465_v13 = vld [vmem:[%s4349_s17 + $0x78] sm:$0xff]  ;;  %v4004_v19 = vld [vmem:[%s5060_s1 + $0x80] sm:$0xff]   ;;  %v4006_v22 = vld [vmem:[%s5060_s1 + $0xc8] sm:$0xff]  }
  0x1e   : > { %3612 = vmatprep.subr.bf16.mxu1 %v3972_v25  ;;  %v364_v16 = vrot.slane %v4465_v13, 7  ;;  %v4005_v21 = vld [vmem:[%s5060_s1 + $0x100] sm:$0xff]   ;;  %v4007_v23 = vld [vmem:[%s5060_s1 + $0x88] sm:$0xff]   ;;  %v4009_v25 = vld [vmem:[%s5060_s1 + $0xd0] sm:$0xff]  }
  0x1f   : > { %v4008_v24 = vld [vmem:[%s5060_s1 + $0x108] sm:$0xff]   ;;  %v4016_v32 = vld [vmem:[%s5060_s1 + $0xa0] sm:$0xff]   ;;  %v3127_v36 = vld [vmem:[%s4349_s17 + $0x90] sm:$0xff] }
  0x20   : > { %3591 = vmatpush3.bf16.msra.mxu0 %v3973_v26  ;;  %v3295_v20 = vpack.c.bf16 %v4469_v15, %v364_v16  ;;  %v4010_v26 = vld [vmem:[%s5060_s1 + $0x90] sm:$0xff]   ;;  %v4017_v33 = vld [vmem:[%s5060_s1 + $0x120] sm:$0xff]   ;;  %v4018_v34 = vld [vmem:[%s5060_s1 + $0xe8] sm:$0xff]   ;;  %v367_v40 = vrot.slane %v3127_v36, 7 }
  0x21   : > { %3613 = vmatpush3.bf16.msra.mxu1 %v3974_v27  ;;  %3592 = vmatprep.subr.bf16.mxu0 %v3975_v28  ;;  %v4011_v27 = vld [vmem:[%s5060_s1 + $0x110] sm:$0xff]   ;;  %v4012_v28 = vld [vmem:[%s5060_s1 + $0xd8] sm:$0xff]   ;;  %v3117_v35 = vld [vmem:[%s4349_s17 + $0x40] sm:$0xff] }
  0x22   : > { %3614 = vmatprep.subr.bf16.mxu1 %v3976_v29  ;;  %v4013_v29 = vld [vmem:[%s5060_s1 + $0x98] sm:$0xff]   ;;  %v4019_v37 = vld [vmem:[%s5060_s1 + $0xa8] sm:$0xff]   ;;  %v4022_v42 = vld [vmem:[%s5060_s1 + $0xb0] sm:$0xff]   ;;  %v3299_v43 = vpack.c.bf16 %v3117_v35, %v367_v40 }
  0x23   : > { %v4020_v38 = vld [vmem:[%s5060_s1 + $0x128] sm:$0xff]   ;;  %v4029_v58 = vld [vmem:[%s5060_s1 + $0x280] sm:$0xff]   ;;  %v4039_v8 = vld [vmem:[%s5060_s1 + $0x2d8] sm:$0xff]  }
  0x24   : > { %3593 = vmatpush3.bf16.msra.mxu0 %v3977_v30  ;;  %v4014_v30 = vld [vmem:[%s5060_s1 + $0x118] sm:$0xff]   ;;  %v4045_v16 = vld [vmem:[%s5060_s1 + $0x2a0] sm:$0xff]  }
  0x25   : > { %3615 = vmatpush3.bf16.msra.mxu1 %v3978_v31  ;;  %3770 = vmatprep.subr.bf16.mxu0 %v4185_v39  ;;  %v4015_v31 = vld [vmem:[%s5060_s1 + $0xe0] sm:$0xff]   ;;  %v4040_v9 = vld [vmem:[%s5060_s1 + $0x358] sm:$0xff]  }
  0x26   : > { %3631 = vmatprep.subr.bf16.mxu1 %v3979_v45  ;;  %v4023_v45 = vld [vmem:[%s5060_s1 + $0x130] sm:$0xff]   ;;  %v4041_v10 = vld [vmem:[%s5060_s1 + $0x298] sm:$0xff]  }
  0x27   : > { %818 = vmatmul.mubr.bf16.vlgmr.msra.gmra.mrb[0].mxu0 %v540_v41  ;;  %v4021_v41 = vld [vmem:[%s5060_s1 + $0xf0] sm:$0xff]   ;;  %v4042_v11 = vld [vmem:[%s5060_s1 + $0x318] sm:$0xff]  }
  0x28   : > { %859 = vmatmul.mubr.bf16.vlgmr.msra.gmra.mrb[0].mxu1 %v542_v44  ;;  %3771 = vmatpush3.bf16.msra.mxu0 %v3980_v46  ;;  %v4549_v44 = vld [vmem:[%s4349_s17 + $0x48] sm:$0xff]  ;;  %v4555_v46 = vld [vmem:[%s4349_s17 + $0x98] sm:$0xff] }
  0x29   : > { %3786 = vmatprep.mubr.msk.bf16.mxu0 %vm4186_vm0, %v4185_v39  ;;  %3632 = vmatpush3.bf16.msra.mxu1 %v3981_v47  ;;  %v4560_v47 = vld [vmem:[%s4349_s17 + $0x88] sm:$0xff] }
  0x2a   : > { %3772 = vmatprep.subr.bf16.mxu0 %v4185_v39  ;;  %3633 = vmatprep.subr.bf16.mxu1 %v3982_v48  ;;  %v1356_v48 = vpack.c.bf16 %v4555_v46, %v4549_v44 }
  0x2b   : > { %3292 = vmatprep.mubr.msk.bf16.mxu1 %vm4455_vm4, %v3291_v14  ;;  %v4044_v14 = vld [vmem:[%s5060_s1 + $0x360] sm:$0xff]  }
  0x2c   : > { %3773 = vmatpush3.bf16.msra.mxu0 %v3983_v49  ;;  %v4024_v49 = vld [vmem:[%s5060_s1 + $0xf8] sm:$0xff]  }
  0x2d   : > { %3634 = vmatpush3.bf16.msra.mxu1 %v3984_v50  ;;  %3774 = vmatprep.subr.bf16.mxu0 %v4185_v39  ;;  %v4025_v50 = vld [vmem:[%s5060_s1 + $0xb8] sm:$0xff]  }
  0x2e   : > { %3635 = vmatprep.subr.bf16.mxu1 %v3985_v51  ;;  %v4026_v51 = vld [vmem:[%s5060_s1 + $0x138] sm:$0xff]  }
  0x30   : > { %3775 = vmatpush3.bf16.msra.mxu0 %v3986_v52  ;;  %v366_v52 = vrot.slane %v4560_v47, 7 }
  0x31   : > { %3636 = vmatpush3.bf16.msra.mxu1 %v3987_v53  ;;  %3776 = vmatprep.subr.bf16.mxu0 %v4185_v39  ;;  %v4576_v53 = vld [vmem:[%s4349_s17 + $0x38] sm:$0xff] }
  0x32   : > { %3637 = vmatprep.subr.bf16.mxu1 %v3988_v54  ;;  %v368_v54 = vrot.slane %v4555_v46, 7 }
  0x34   : > { %3777 = vmatpush3.bf16.msra.mxu0 %v3989_v55  ;;  %v4027_v55 = vld [vmem:[%s5060_s1 + $0x2c0] sm:$0xff]  }
  0x35   : > { %3638 = vmatpush3.bf16.msra.mxu1 %v3990_v56  ;;  %3778 = vmatprep.subr.bf16.mxu0 %v4185_v39  ;;  %v4028_v56 = vld [vmem:[%s5060_s1 + $0x340] sm:$0xff]  }
  0x36   : > { %3639 = vmatprep.subr.bf16.mxu1 %v3991_v57  ;;  %v3303_v57 = vpack.c.bf16 %v4576_v53, %v366_v52 }
  0x38   : > { %3779 = vmatpush3.bf16.msra.mxu0 %v3992_v59  ;;  %v3307_v59 = vpack.c.bf16 %v4549_v44, %v368_v54  ;;  %v4068_v54 = vld [vmem:[%s5062_s3 + $0x18] sm:$0xff]  }
  0x39   : > { %3640 = vmatpush3.bf16.msra.mxu1 %v3993_v60  ;;  %3780 = vmatprep.subr.bf16.mxu0 %v4185_v39  ;;  %v4030_v60 = vld [vmem:[%s5060_s1 + $0x300] sm:$0xff]  }
  0x3a   : > { %3641 = vmatprep.subr.bf16.mxu1 %v3994_v61  ;;  %v4031_v61 = vld [vmem:[%s5060_s1 + $0x2c8] sm:$0xff]  }
  0x3c   : > { %3781 = vmatpush3.bf16.msra.mxu0 %v3995_v63  ;;  %v4032_v63 = vld [vmem:[%s5060_s1 + $0x348] sm:$0xff]  }
  0x3d   : > { %3642 = vmatpush3.bf16.msra.mxu1 %v3996_v0  ;;  %3782 = vmatprep.subr.bf16.mxu0 %v4185_v39  ;;  %v1353_v0 = vpack.c.bf16 %v4447_v6, %v4444_v5  ;;  %v4036_v5 = vld [vmem:[%s5060_s1 + $0x350] sm:$0xff]  }
  0x3e   : > { %3643 = vmatprep.subr.bf16.mxu1 %v3997_v1  ;;  %v4033_v1 = vld [vmem:[%s5060_s1 + $0x288] sm:$0xff]   ;;  %v4037_v6 = vld [vmem:[%s5060_s1 + $0x290] sm:$0xff]  }
  0x40   : > { %3783 = vmatpush3.bf16.msra.mxu0 %v3998_v2  ;;  %v1355_v2 = vpack.c.bf16 %v3127_v36, %v3117_v35  ;;  %v4064_v35 = vld [vmem:[%s5060_s1 + $0x3a8] sm:$0xff]   ;;  %v4065_v36 = vld [vmem:[%s5060_s1 + $0x3b0] sm:$0xff]  }
  0x41   : > { %3644 = vmatpush3.bf16.msra.mxu1 %v3999_v3  ;;  %3784 = vmatprep.subr.bf16.mxu0 %v4185_v39  ;;  %v4034_v3 = vld [vmem:[%s5060_s1 + $0x308] sm:$0xff]  }
  0x42   : > { %3645 = vmatprep.subr.bf16.mxu1 %v4000_v4  ;;  %v4035_v4 = vld [vmem:[%s5060_s1 + $0x2d0] sm:$0xff]  }
  0x44   : > { %3785 = vmatpush3.bf16.msra.mxu0 %v4001_v7  ;;  %v4038_v7 = vld [vmem:[%s5060_s1 + $0x310] sm:$0xff]  }
  0x45   : > { %3646 = vmatpush3.bf16.msra.mxu1 %v4002_v12  ;;  %3653 = vmatprep.subr.bf16.mxu0 %v4003_v17  ;;  %v4043_v12 = vld [vmem:[%s5060_s1 + $0x2e0] sm:$0xff]  }
  0x46   : > { %3790 = vmatprep.subr.bf16.mxu1 %v4185_v39  ;;  %v4046_v17 = vld [vmem:[%s5060_s1 + $0x320] sm:$0xff]  }
  0x47   : > { %3787 = vmatmul.mubr.bf16.vlgmr.msra.gmra.mrb[4].mxu0 %v544_v18  ;;  %v4047_v18 = vld [vmem:[%s5060_s1 + $0x2e8] sm:$0xff]  }
  0x48   : > { %3296 = vmatmul.mubr.msk.bf16.vlgmr.msra.gmra.mrb[4].mxu1 %vm4455_vm4, %v3295_v20  ;;  %3654 = vmatpush3.bf16.msra.mxu0 %v4004_v19  ;;  %v4048_v19 = vld [vmem:[%s5060_s1 + $0x368] sm:$0xff]  }
  0x49   : > { %3791 = vmatpush3.bf16.msra.mxu1 %v4005_v21  ;;  %3655 = vmatprep.subr.bf16.mxu0 %v4006_v22  ;;  %v4049_v20 = vld [vmem:[%s5060_s1 + $0x2a8] sm:$0xff]   ;;  %v4051_v22 = vld [vmem:[%s5060_s1 + $0x2f0] sm:$0xff]  }
  0x4a   : > { %3792 = vmatprep.subr.bf16.mxu1 %v4185_v39  ;;  %3806 = vmatprep.mubr.msk.bf16.mxu1 %vm4186_vm0, %v4185_v39  ;;  %v4050_v21 = vld [vmem:[%s5060_s1 + $0x328] sm:$0xff]  }
  0x4b   : > { %3300 = vmatprep.mubr.msk.bf16.mxu0 %vm4455_vm4, %v3299_v43 }
  0x4c   : > { %3656 = vmatpush3.bf16.msra.mxu0 %v4007_v23  ;;  %v4052_v23 = vld [vmem:[%s5060_s1 + $0x370] sm:$0xff]  }
  0x4d   : > { %3793 = vmatpush3.bf16.msra.mxu1 %v4008_v24  ;;  %3657 = vmatprep.subr.bf16.mxu0 %v4009_v25  ;;  %v4053_v24 = vld [vmem:[%s5060_s1 + $0x2b0] sm:$0xff]  }
  0x4e   : > { %3794 = vmatprep.subr.bf16.mxu1 %v4185_v39  ;;  %v4054_v25 = vld [vmem:[%s5060_s1 + $0x330] sm:$0xff]  }
  0x50   : > { %3658 = vmatpush3.bf16.msra.mxu0 %v4010_v26  ;;  %v4055_v26 = vld [vmem:[%s5060_s1 + $0x2f8] sm:$0xff]  }
  0x51   : > { %3795 = vmatpush3.bf16.msra.mxu1 %v4011_v27  ;;  %3659 = vmatprep.subr.bf16.mxu0 %v4012_v28  ;;  %v4056_v27 = vld [vmem:[%s5060_s1 + $0x378] sm:$0xff]  }
  0x52   : > { %3796 = vmatprep.subr.bf16.mxu1 %v4185_v39  ;;  %v4057_v28 = vld [vmem:[%s5060_s1 + $0x2b8] sm:$0xff]  }
  0x54   : > { %3660 = vmatpush3.bf16.msra.mxu0 %v4013_v29  ;;  %v4058_v29 = vld [vmem:[%s5060_s1 + $0x338] sm:$0xff]  }
  0x55   : > { %3797 = vmatpush3.bf16.msra.mxu1 %v4014_v30  ;;  %3661 = vmatprep.subr.bf16.mxu0 %v4015_v31  ;;  %v4059_v30 = vld [vmem:[%s5060_s1 + $0x380] sm:$0xff]   ;;  %v1352_v31 = vpack.c.bf16 %v4465_v13, %v4469_v15  ;;  %v4061_v13 = vld [vmem:[%s5060_s1 + $0x390] sm:$0xff]   ;;  %v4062_v15 = vld [vmem:[%s5060_s1 + $0x398] sm:$0xff]  }
  0x56   : > { %3798 = vmatprep.subr.bf16.mxu1 %v4185_v39 }
  0x58   : > { %3662 = vmatpush3.bf16.msra.mxu0 %v4016_v32  ;;  %v1354_v32 = vpack.c.bf16 %v4560_v47, %v4576_v53  ;;  %v4067_v53 = vld [vmem:[%s5062_s3 + $0x10] sm:$0xff]  }
  0x59   : > { %3799 = vmatpush3.bf16.msra.mxu1 %v4017_v33  ;;  %3663 = vmatprep.subr.bf16.mxu0 %v4018_v34  ;;  %v4060_v33 = vld [vmem:[%s5060_s1 + $0x388] sm:$0xff]   ;;  %v4063_v34 = vld [vmem:[%s5060_s1 + $0x3a0] sm:$0xff]  }
  0x5a   : > { %3800 = vmatprep.subr.bf16.mxu1 %v4185_v39 }
  0x5c   : > { %3664 = vmatpush3.bf16.msra.mxu0 %v4019_v37  ;;  %v4066_v37 = vld [vmem:[%s5060_s1 + $0x3b8] sm:$0xff]  }
  0x5d   : > { %3801 = vmatpush3.bf16.msra.mxu1 %v4020_v38  ;;  %3665 = vmatprep.subr.bf16.mxu0 %v4021_v41 }
  0x5e   : > { %3802 = vmatprep.subr.bf16.mxu1 %v4185_v39 }
  0x60   : > { %3666 = vmatpush3.bf16.msra.mxu0 %v4022_v42 }
  0x61   : > { %3803 = vmatpush3.bf16.msra.mxu1 %v4023_v45  ;;  %3667 = vmatprep.subr.bf16.mxu0 %v4024_v49 }
  0x62   : > { %3804 = vmatprep.subr.bf16.mxu1 %v4185_v39 }
  0x64   : > { %3668 = vmatpush3.bf16.msra.mxu0 %v4025_v50 }
  0x65   : > { %3805 = vmatpush3.bf16.msra.mxu1 %v4026_v51  ;;  %3684 = vmatprep.subr.bf16.mxu0 %v4027_v55 }
  0x66   : > { %3706 = vmatprep.subr.bf16.mxu1 %v4028_v56 }
  0x67   : > { %3304 = vmatmul.mubr.msk.bf16.vlgmr.msra.gmra.mrb[8].mxu0 %vm4455_vm4, %v3303_v57 }
  0x68   : > { %3807 = vmatmul.mubr.msk.bf16.vlgmr.msra.gmra.mrb[8].mxu1 %vm4455_vm4, %v3307_v59  ;;  %3685 = vmatpush3.bf16.msra.mxu0 %v4029_v58 }
  0x69   : > { %3707 = vmatpush3.bf16.msra.mxu1 %v4030_v60  ;;  %3686 = vmatprep.subr.bf16.mxu0 %v4031_v61 }
  0x6a   : > { %3708 = vmatprep.subr.bf16.mxu1 %v4032_v63  ;;  %1629 = vmatprep.mubr.bf16.mxu0 %v1353_v0 }
  0x6b   : > { %1670 = vmatprep.mubr.bf16.mxu1 %v1355_v2 }
  0x6c   : > { %3687 = vmatpush3.bf16.msra.mxu0 %v4033_v1 }
  0x6d   : > { %3709 = vmatpush3.bf16.msra.mxu1 %v4034_v3  ;;  %3688 = vmatprep.subr.bf16.mxu0 %v4035_v4 }
  0x6e   : > { %3710 = vmatprep.subr.bf16.mxu1 %v4036_v5 }
  0x70   : > { %3689 = vmatpush3.bf16.msra.mxu0 %v4037_v6 }
  0x71   : > { %3711 = vmatpush3.bf16.msra.mxu1 %v4038_v7  ;;  %3690 = vmatprep.subr.bf16.mxu0 %v4039_v8 }
  0x72   : > { %3712 = vmatprep.subr.bf16.mxu1 %v4040_v9 }
  0x74   : > { %3691 = vmatpush3.bf16.msra.mxu0 %v4041_v10 }
  0x75   : > { %3713 = vmatpush3.bf16.msra.mxu1 %v4042_v11  ;;  %3692 = vmatprep.subr.bf16.mxu0 %v4043_v12 }
  0x76   : > { %3714 = vmatprep.subr.bf16.mxu1 %v4044_v14 }
  0x78   : > { %3693 = vmatpush3.bf16.msra.mxu0 %v4045_v16 }
  0x79   : > { %3715 = vmatpush3.bf16.msra.mxu1 %v4046_v17  ;;  %3694 = vmatprep.subr.bf16.mxu0 %v4047_v18 }
  0x7a   : > { %3716 = vmatprep.subr.bf16.mxu1 %v4048_v19 }
  0x7c   : > { %3695 = vmatpush3.bf16.msra.mxu0 %v4049_v20 }
  0x7d   : > { %3717 = vmatpush3.bf16.msra.mxu1 %v4050_v21  ;;  %3696 = vmatprep.subr.bf16.mxu0 %v4051_v22 }
  0x7e   : > { %3718 = vmatprep.subr.bf16.mxu1 %v4052_v23 }
  0x80   : > { %3697 = vmatpush3.bf16.msra.mxu0 %v4053_v24 }
  0x81   : > { %3719 = vmatpush3.bf16.msra.mxu1 %v4054_v25  ;;  %3698 = vmatprep.subr.bf16.mxu0 %v4055_v26 }
  0x82   : > { %3720 = vmatprep.subr.bf16.mxu1 %v4056_v27 }
  0x84   : > { %3699 = vmatpush3.bf16.msra.mxu0 %v4057_v28 }
  0x85   : > { %3721 = vmatpush3.bf16.msra.mxu1 %v4058_v29  ;;  %3810 = vmatprep.subr.bf16.mxu0 %v4185_v39 }
  0x86   : > { %3830 = vmatprep.subr.bf16.mxu1 %v4185_v39 }
  0x87   : > { %1630 = vmatmul.mubr.bf16.vlgmr.msra.gmra.mrb[12].mxu0 %v1352_v31 }
  0x88   : > { %1671 = vmatmul.mubr.bf16.vlgmr.msra.gmra.mrb[12].mxu1 %v1354_v32  ;;  %3811 = vmatpush3.bf16.msra.mxu0 %v4059_v30 }
  0x89   : > { %3812 = vmatprep.subr.bf16.mxu0 %v4185_v39  ;;  %3826 = vmatprep.mubr.msk.bf16.mxu0 %vm4186_vm0, %v4185_v39 }
  0x8a   : > { %3834 = vmatprep.mubr.msk.bf16.mxu1 %vm4186_vm0, %v4185_v39  ;;  %3831 = vmatpush3.bf16.msra.mxu1 %v4067_v53 }
  0x8b   : > { %3832 = vmatprep.subr.bf16.mxu1 %v4185_v39 }
  0x8c   : > { %3813 = vmatpush3.bf16.msra.mxu0 %v4060_v33 }
  0x8d   : > { %3814 = vmatprep.subr.bf16.mxu0 %v4185_v39 }
  0x8e   : > { %3833 = vmatpush3.bf16.msra.mxu1 %v4068_v54 }
  0x8f   : > { %3838 = vmatprep.subr.bf16.mxu1 %v4185_v39 }
  0x90   : > { %3815 = vmatpush3.bf16.msra.mxu0 %v4061_v13 }
  0x91   : > { %3816 = vmatprep.subr.bf16.mxu0 %v4185_v39 }
  0x94   : > { %3817 = vmatpush3.bf16.msra.mxu0 %v4062_v15 }
  0x95   : > { %3818 = vmatprep.subr.bf16.mxu0 %v4185_v39 }
  0x98   : > { %3819 = vmatpush3.bf16.msra.mxu0 %v4063_v34 }
  0x99   : > { %3820 = vmatprep.subr.bf16.mxu0 %v4185_v39 }
  0x9c   : > { %3821 = vmatpush3.bf16.msra.mxu0 %v4064_v35 }
  0x9d   : > { %3822 = vmatprep.subr.bf16.mxu0 %v4185_v39 }
  0xa0   : > { %3823 = vmatpush3.bf16.msra.mxu0 %v4065_v36 }
  0xa1   : > { %3824 = vmatprep.subr.bf16.mxu0 %v4185_v39 }
  0xa4   : > { %3825 = vmatpush3.bf16.msra.mxu0 %v4066_v37  ;;  %v3429_v37 = vld [vmem:[%s5061_s2] ss:$0 sm:$0xff] }
  0xa5   : > { %3862 = vmatprep.subr.bf16.mxu0 %v4185_v39 }
  0xa7   : > { %3827 = vmatmul.mubr.bf16.vlgmr.msra.gmra.mrb[16].mxu0 %v1356_v48 }
  0xa8   : > { %3866 = vmatprep.mubr.msk.bf16.mxu0 %vm4186_vm0, %v4185_v39 }
  0xfa   : > { %v3594_v38 = vpop.f32.mrb[0].mxu0 }
  0xfb   : > { %v3616_v40 = vpop.f32.mrb[0].mxu1  ;;  %v3595_v41 = vpop.f32.mrb[1].mxu0 }
  0xfc   : > { %v3596_v42 = vadd.f32 %v3595_v41, %v3594_v38  ;;  %v3617_v43 = vpop.f32.mrb[1].mxu1  ;;  %v3597_v45 = vpop.f32.mrb[2].mxu0 }
  0xfd   : > { %v3618_v47 = vadd.f32 %v3617_v43, %v3616_v40  ;;  %v3619_v49 = vpop.f32.mrb[2].mxu1  ;;  %v3598_v50 = vpop.f32.mrb[3].mxu0 }
  0xfe   : > { %v3599_v51 = vadd.f32 %v3598_v50, %v3597_v45  ;;  %v3620_v52 = vpop.f32.mrb[3].mxu1  ;;  %v4069_v50 = vld [vmem:[%s5062_s3] sm:$0xff]  }
  0xff   : > { %v3621_v44 = vadd.f32 %v3620_v52, %v3619_v49  ;;  %v861_v46 = vadd.f32 %v3618_v47, %v3596_v42 }
 0x101   : > { %v864_v48 = vadd.f32 %v3621_v44, %v3599_v51  ;;  %v4070_v44 = vld [vmem:[%s5062_s3 + $0x8] sm:$0xff]  }
 0x11a   : > { %v901_v55 = vpop.f32.mrb[4].mxu0 }
 0x11b   : > { %v902_v56 = vadd.f32 %v901_v55, %v861_v46  ;;  %v3647_v57 = vpop.f32.mrb[4].mxu1  ;;  %v3788_v58 = vpop.f32.mrb[5].mxu0  ;;  %v4072_v55 = vld [vmem:[%s5062_s3 + $0x28] sm:$0xff]  }
 0x11c   : > { %v3648_v59 = vpop.f32.mrb[5].mxu1  ;;  %v904_v60 = vpop.f32.mrb[6].mxu0  ;;  %v4074_v58 = vld [vmem:[%s5064_s5 + $0x30] sm:$0xff]  }
 0x11d   : > { %v3649_v61 = vadd.f32 %v3648_v59, %v3647_v57  ;;  %v905_v63 = vadd.f32 %v904_v60, %v864_v48  ;;  %v3650_v0 = vpop.f32.mrb[6].mxu1  ;;  %v3789_v1 = vpop.f32.mrb[7].mxu0  ;;  %v4071_v48 = vld [vmem:[%s5062_s3 + $0x20] sm:$0xff]   ;;  %v4073_v57 = vld [vmem:[%s5064_s5 + $0x10] sm:$0xff]   ;;  %v4075_v59 = vld [vmem:[%s5064_s5 + $0x18] sm:$0xff]  }
 0x11e   : > { %v3651_v2 = vpop.f32.mrb[7].mxu1  ;;  %3863 = vmatpush3.bf16.msra.mxu0 %v4073_v57  ;;  %v4076_v60 = vld [vmem:[%s5064_s5 + $0x38] sm:$0xff]  }
 0x11f   : > { %v1183_v3 = vadd.f32 %v3649_v61, %v902_v56  ;;  %v3652_v4 = vadd.f32 %v3651_v2, %v3650_v0  ;;  %3864 = vmatprep.subr.bf16.mxu0 %v4185_v39 }
 0x121   : > { %v1186_v5 = vadd.f32 %v3652_v4, %v905_v63 }
 0x122   : > { %3865 = vmatpush3.bf16.msra.mxu0 %v4075_v59 }
 0x123   : > { %3878 = vmatprep.subr.bf16.mxu0 %v4185_v39 }
 0x13a   : > { %v3669_v6 = vpop.f32.mrb[8].mxu0 }
 0x13b   : > { %v3670_v7 = vpop.f32.mrb[9].mxu0  ;;  %v1264_v8 = vpop.f32.mrb[8].mxu1 }
 0x13c   : > { %v3671_v9 = vadd.f32 %v3670_v7, %v3669_v6  ;;  %v3672_v10 = vpop.f32.mrb[10].mxu0  ;;  %v3808_v11 = vpop.f32.mrb[9].mxu1  ;;  %v3447_v7 = vld [vmem:[%s5063_s4] ss:$0 sm:$0xff] }
 0x13d   : > { %v3673_v12 = vpop.f32.mrb[11].mxu0  ;;  %v1267_v14 = vpop.f32.mrb[10].mxu1 }
 0x13e   : > { %v3674_v16 = vadd.f32 %v3673_v12, %v3672_v10  ;;  %v1224_v17 = vadd.f32 %v3671_v9, %v1183_v3  ;;  %v3809_v18 = vpop.f32.mrb[11].mxu1 }
 0x140   : > { %v1265_v19 = vadd.f32 %v1264_v8, %v1224_v17  ;;  %v1227_v20 = vadd.f32 %v3674_v16, %v1186_v5  ;;  %v4077_v17 = vld [vmem:[%s5064_s5] sm:$0xff]  }
 0x142   : > { %v1268_v21 = vadd.f32 %v1267_v14, %v1227_v20 }
 0x15a   : > { %v3700_v22 = vpop.f32.mrb[12].mxu0 }
 0x15b   : > { %v3722_v23 = vpop.f32.mrb[12].mxu1  ;;  %v3701_v24 = vpop.f32.mrb[13].mxu0 }
 0x15c   : > { %v3702_v25 = vadd.f32 %v3701_v24, %v3700_v22  ;;  %v3723_v26 = vpop.f32.mrb[13].mxu1  ;;  %v3703_v27 = vpop.f32.mrb[14].mxu0  ;;  %v4078_v22 = vld [vmem:[%s5064_s5 + $0x20] sm:$0xff]   ;;  %v4079_v24 = vld [vmem:[%s5064_s5 + $0x8] sm:$0xff]  }
 0x15d   : > { %v3724_v28 = vadd.f32 %v3723_v26, %v3722_v23  ;;  %v3725_v29 = vpop.f32.mrb[14].mxu1  ;;  %v3704_v30 = vpop.f32.mrb[15].mxu0  ;;  %v4080_v26 = vld [vmem:[%s5064_s5 + $0x28] sm:$0xff]  }
 0x15e   : > { %v3705_v31 = vadd.f32 %v3704_v30, %v3703_v27  ;;  %v3726_v32 = vpop.f32.mrb[15].mxu1  ;;  %v4081_v30 = vld [vmem:[%s5066_s7 + $0xf8] ss:$20 sps:$4 sm:$0xff]  }
 0x15f   : > { %v3727_v33 = vadd.f32 %v3726_v32, %v3725_v29  ;;  %v1673_v13 = vadd.f32 %v3724_v28, %v3702_v25  ;;  %v4083_v28 = vld [vmem:[%s5066_s7 + $0xfc] ss:$20 sps:$4 sm:$0xff]   ;;  %v4086_v29 = vld [vmem:[%s5066_s7 + $0xf4] ss:$20 sps:$4 sm:$0xff]   ;;  %v4089_v32 = vld [vmem:[%s5066_s7 + $0x124] ss:$20 sps:$4 sm:$0xff]  }
 0x161   : > { %v1676_v15 = vadd.f32 %v3727_v33, %v3705_v31  ;;  %v4084_v31 = vld [vmem:[%s5066_s7 + $0xf0] ss:$20 sps:$4 sm:$0xff]  }
 0x162   : > { %v4092_v33 = vld [vmem:[%s5066_s7 + $0x11c] ss:$20 sps:$4 sm:$0xff]  }
 0x17a   : > { %v1713_v34 = vpop.f32.mrb[16].mxu0 }
 0x17b   : > { %v1714_v35 = vadd.f32 %v1713_v34, %v1673_v13  ;;  %v3828_v36 = vpop.f32.mrb[17].mxu0  ;;  %v4087_v13 = vld [vmem:[%s5066_s7 + $0x120] ss:$20 sps:$4 sm:$0xff]   ;;  %v4095_v34 = vld [vmem:[%s5066_s7 + $0x5c] ss:$20 sps:$4 sm:$0xff]  }
 0x17c   : > { %v1716_v38 = vpop.f32.mrb[18].mxu0 }
 0x17d   : > { %v1720_v40 = vadd.f32 %v1714_v35, %v1265_v19  ;;  %v1717_v41 = vadd.f32 %v1716_v38, %v1676_v15  ;;  %v3829_v42 = vpop.f32.mrb[19].mxu0  ;;  %v4090_v15 = vld [vmem:[%s5066_s7 + $0x118] ss:$20 sps:$4 sm:$0xff]   ;;  %v4188_v35 = vmov 0  }
 0x17f   : > { %v1728_v43 = vadd.f32 %v3429_v37, %v1720_v40  ;;  %v1721_v45 = vadd.f32 %v1717_v41, %v1268_v21  ;;  %v3462_v40 = vld [vmem:[%s5065_s6] ss:$0 sm:$0xff] }
 0x181   : > { %v1730_v47 = vmax.f32 %v1728_v43, 0.0  ;;  %v1729_v49 = vadd.f32 %v3429_v37, %v1721_v45 }
 0x183   : > { %v1744_v51 = vpack.c.bf16 %v1730_v47, %v1730_v47  ;;  %v1731_v52 = vmax.f32 %v1729_v49, 0.0 }
 0x185   : > { %v1732_v53 = vrot.slane %v1731_v52, 7  ;;  %3835 = vmatmul.mubr.msk.bf16.vlgmr.msra.gmra.mrb[16].mxu1 %vm1757_vm5, %v1744_v51  ;;  %v1861_v56 = vpack.c.bf16 %v1731_v52, %v1731_v52 }
 0x186   : > { %3839 = vmatpush3.bf16.msra.mxu1 %v4069_v50  ;;  %3842 = vmatprep.mubr.msk.bf16.mxu1 %vm4186_vm0, %v4185_v39 }
 0x187   : > { %3840 = vmatprep.subr.bf16.mxu1 %v4185_v39  ;;  %v1733_v46 = vsel %vm363_vm1, 0.0, %v1732_v53 }
 0x188   : > { %v1738_v54 = vpack.c.bf16 %v1733_v46, %v1733_v46 }
 0x18a   : > { %3841 = vmatpush3.bf16.msra.mxu1 %v4070_v44 }
 0x18b   : > { %3846 = vmatprep.subr.bf16.mxu1 %v4185_v39 }
 0x18d   : > { %3843 = vmatmul.mubr.msk.bf16.vlgmr.msra.gmra.mrb[20].mxu1 %vm1757_vm5, %v1738_v54 }
 0x18e   : > { %3847 = vmatpush3.bf16.msra.mxu1 %v4071_v48  ;;  %3850 = vmatprep.mubr.msk.bf16.mxu1 %vm4186_vm0, %v4185_v39 }
 0x18f   : > { %3848 = vmatprep.subr.bf16.mxu1 %v4185_v39 }
 0x192   : > { %3849 = vmatpush3.bf16.msra.mxu1 %v4072_v55 }
 0x193   : > { %3854 = vmatprep.subr.bf16.mxu1 %v4185_v39 }
 0x195   : > { %3851 = vmatmul.mubr.msk.bf16.vlgmr.msra.gmra.mrb[24].mxu1 %vm1757_vm5, %v1861_v56 }
 0x196   : > { %3858 = vmatprep.mubr.msk.bf16.mxu1 %vm4186_vm0, %v4185_v39  ;;  %3855 = vmatpush3.bf16.msra.mxu1 %v4074_v58 }
 0x197   : > { %3856 = vmatprep.subr.bf16.mxu1 %v4185_v39 }
 0x19a   : > { %3857 = vmatpush3.bf16.msra.mxu1 %v4076_v60 }
 0x19b   : > { %3870 = vmatprep.subr.bf16.mxu1 %v4185_v39 }
 0x258   : > { %v1795_v61 = vpop.f32.mrb[16].mxu1 }
 0x259   : > { %v3836_v63 = vpop.f32.mrb[17].mxu1 }
 0x25a   : > { %v1798_v0 = vpop.f32.mrb[18].mxu1 }
 0x25b   : > { %v3837_v1 = vpop.f32.mrb[19].mxu1 }
 0x260   : > { %v1850_v2 = vpop.f32.mrb[20].mxu1 }
 0x261   : > { %v1851_v3 = vadd.f32 %v1850_v2, %v1795_v61  ;;  %v3844_v4 = vpop.f32.mrb[21].mxu1 }
 0x262   : > { %v1853_v5 = vpop.f32.mrb[22].mxu1  ;;  %v4096_v4 = vld [vmem:[%s5066_s7 + $0x100] ss:$20 sps:$4 sm:$0xff]  }
 0x263   : > { %v3845_v6 = vpop.f32.mrb[23].mxu1 }
 0x264   : > { %v4100_v6 = vld [vmem:[%s5066_s7 + $0x84] ss:$20 sps:$4 sm:$0xff]  }
 0x268   : > { %v1911_v8 = vpop.f32.mrb[24].mxu1 }
 0x269   : > { %v1917_v9 = vadd.f32 %v1911_v8, %v1851_v3  ;;  %v3852_v10 = vpop.f32.mrb[25].mxu1  ;;  %v4093_v3 = vld [vmem:[%s5066_s7 + $0x58] ss:$20 sps:$4 sm:$0xff]   ;;  %v4098_v8 = vld [vmem:[%s5066_s7 + $0x80] ss:$20 sps:$4 sm:$0xff]  }
 0x26a   : > { %v1914_v11 = vpop.f32.mrb[26].mxu1  ;;  %v4101_v10 = vld [vmem:[%s5066_s7 + $0x50] ss:$20 sps:$4 sm:$0xff]  }
 0x26b   : > { %v1924_v12 = vadd.f32 %v3447_v7, %v1917_v9  ;;  %v3853_v14 = vpop.f32.mrb[27].mxu1  ;;  %v4097_v7 = vld [vmem:[%s5066_s7 + $0x128] ss:$20 sps:$4 sm:$0xff]  }
 0x26c   : > { %v4103_v9 = vld [vmem:[%s5066_s7 + $0x54] ss:$20 sps:$4 sm:$0xff]   ;;  %v4106_v11 = vld [vmem:[%s5066_s7 + $0x7c] ss:$20 sps:$4 sm:$0xff]  }
 0x26d   : > { %v1925_v16 = vmax.f32 %v1924_v12, 0.0  ;;  %v4104_v12 = vld [vmem:[%s5066_s7 + $0x78] ss:$20 sps:$4 sm:$0xff]   ;;  %v4107_v14 = vld [vmem:[%s5066_s7 + $0x60] ss:$20 sps:$4 sm:$0xff]  }
 0x26f   : > { %v1931_v18 = vpack.c.bf16 %v1925_v16, %v1925_v16  ;;  %v1932_v19 = vrot.slane %v1925_v16, 7  ;;  %v2059_v20 = vrot.slane %v1925_v16, 1  ;;  %v4111_v16 = vld [vmem:[%s5066_s7 + $0xa4] ss:$20 sps:$4 sm:$0xff]  }
 0x271   : > { %v1933_v21 = vsel %vm363_vm1, 0.0, %v1932_v19  ;;  %3867 = vmatmul.mubr.msk.bf16.vlgmr.msra.gmra.mrb[20].mxu0 %vm1757_vm5, %v1931_v18  ;;  %v2060_v25 = vsel %vm2058_vm6, 0.0, %v2059_v20  ;;  %v4114_v19 = vld [vmem:[%s5066_s7 + $0xac] ss:$20 sps:$4 sm:$0xff]  }
 0x272   : > { %v1939_v23 = vpack.c.bf16 %v1933_v21, %v1933_v21  ;;  %3879 = vmatpush3.bf16.msra.mxu0 %v4077_v17  ;;  %3882 = vmatprep.mubr.msk.bf16.mxu0 %vm4186_vm0, %v4185_v39  ;;  %v2065_v27 = vpack.c.bf16 %v2060_v25, %v2060_v25  ;;  %v4108_v17 = vld [vmem:[%s5066_s7 + $0x88] ss:$20 sps:$4 sm:$0xff]   ;;  %v4117_v20 = vld [vmem:[%s5066_s7 + $0xcc] ss:$20 sps:$4 sm:$0xff]   ;;  %v4121_v25 = vld [vmem:[%s5066_s7 + $0xb0] ss:$20 sps:$4 sm:$0xff]  }
 0x273   : > { %3880 = vmatprep.subr.bf16.mxu0 %v4185_v39  ;;  %v4112_v21 = vld [vmem:[%s5066_s7 + $0xa8] ss:$20 sps:$4 sm:$0xff]  }
 0x274   : > { %3859 = vmatmul.mubr.msk.bf16.vlgmr.msra.gmra.mrb[28].mxu1 %vm1757_vm5, %v1939_v23  ;;  %v4120_v23 = vld [vmem:[%s5066_s7 + $0xd4] ss:$20 sps:$4 sm:$0xff]  }
 0x275   : > { %3871 = vmatpush3.bf16.msra.mxu1 %v4078_v22  ;;  %3874 = vmatprep.mubr.msk.bf16.mxu1 %vm4186_vm0, %v4185_v39  ;;  %v4115_v22 = vld [vmem:[%s5066_s7 + $0xc8] ss:$20 sps:$4 sm:$0xff]  }
 0x276   : > { %3881 = vmatpush3.bf16.msra.mxu0 %v4079_v24  ;;  %3872 = vmatprep.subr.bf16.mxu1 %v4185_v39  ;;  %v4118_v24 = vld [vmem:[%s5066_s7 + $0xd0] ss:$20 sps:$4 sm:$0xff]  }
 0x277   : > { %2310 = vmatprep.subr.bf16.mxu0 %v4083_v28  ;;  %v4125_v28 = vld [vmem:[%s5066_s7 + $0xd8] ss:$20 sps:$4 sm:$0xff]  }
 0x279   : > { %3873 = vmatpush3.bf16.msra.mxu1 %v4080_v26  ;;  %3883 = vmatmul.mubr.msk.bf16.vlgmr.msra.gmra.mrb[24].mxu0 %vm1757_vm5, %v2065_v27  ;;  %v4124_v26 = vld [vmem:[%s5066_s7 + $0xc] ss:$20 sps:$4 sm:$0xff]   ;;  %v4122_v27 = vld [vmem:[%s5066_s7 + $0x8] ss:$20 sps:$4 sm:$0xff]  }
 0x27a   : > { %2267 = vmatprep.subr.bf16.mxu1 %v4086_v29  ;;  %2311 = vmatpush1.bf16.msra.mxu0 %v4081_v30  ;;  %v4128_v29 = vld [vmem:[%s5066_s7 + $0x4] ss:$20 sps:$4 sm:$0xff]   ;;  %v4131_v30 = vld [vmem:[%s5066_s7 + $0x34] ss:$20 sps:$4 sm:$0xff]  }
 0x27b   : > { %2312 = vmatprep.subr.bf16.mxu0 %v4089_v32  ;;  %2342 = vmatprep.mubr.bf16.mxu0 %v4188_v35  ;;  %v4129_v32 = vld [vmem:[%s5066_s7 + $0x30] ss:$20 sps:$4 sm:$0xff]  }
 0x27c   : > { %3875 = vmatmul.mubr.msk.bf16.vlgmr.msra.gmra.mrb[32].mxu1 %vm1757_vm5, %v1931_v18  ;;  %v4109_v18 = vld [vmem:[%s5066_s7 + $0xa0] ss:$20 sps:$4 sm:$0xff]  }
 0x27d   : > { %2268 = vmatpush1.bf16.msra.mxu1 %v4084_v31  ;;  %2299 = vmatprep.mubr.bf16.mxu1 %v4188_v35  ;;  %v4126_v31 = vld [vmem:[%s5066_s7] ss:$20 sps:$4 sm:$0xff]  }
 0x27e   : > { %2269 = vmatprep.subr.bf16.mxu1 %v4092_v33  ;;  %2313 = vmatpush1.bf16.msra.mxu0 %v4087_v13  ;;  %v4134_v33 = vld [vmem:[%s5066_s7 + $0x2c] ss:$20 sps:$4 sm:$0xff]   ;;  %v4132_v13 = vld [vmem:[%s5066_s7 + $0x28] ss:$20 sps:$4 sm:$0xff]  }
 0x27f   : > { %2492 = vmatprep.subr.bf16.mxu0 %v4095_v34  ;;  %v4136_v34 = vld [vmem:[%s5066_s7 + $0x38] ss:$20 sps:$4 sm:$0xff]  }
 0x281   : > { %2270 = vmatpush1.bf16.msra.mxu1 %v4090_v15  ;;  %v4135_v15 = vld [vmem:[%s5066_s7 + $0x10] ss:$20 sps:$4 sm:$0xff]  }
 0x282   : > { %3886 = vmatprep.subr.bf16.mxu1 %v4185_v39 }
 0x344   : > { %v2044_v36 = vpop.f32.mrb[20].mxu0 }
 0x345   : > { %v3868_v37 = vpop.f32.mrb[21].mxu0 }
 0x346   : > { %v2047_v38 = vpop.f32.mrb[22].mxu0  ;;  %v2591_v37 = vsub.s32 3, %v4420_v62 }
 0x347   : > { %v1989_v41 = vpop.f32.mrb[28].mxu1  ;;  %v3869_v42 = vpop.f32.mrb[23].mxu0 }
 0x348   : > { %v2045_v43 = vadd.f32 %v2044_v36, %v1989_v41  ;;  %v3860_v45 = vpop.f32.mrb[29].mxu1  ;;  %v337_v36 = vld [vmem:[%s5067_s8] sm:$0x1f]  ;;  %v2579_v42 = vsub.s32 0, %v4420_v62 }
 0x349   : > { %v1992_v47 = vpop.f32.mrb[30].mxu1  ;;  %v2583_v45 = vsub.s32 1, %v4420_v62 }
 0x34a   : > { %v2056_v49 = vadd.f32 %v3462_v40, %v2045_v43  ;;  %v3861_v50 = vpop.f32.mrb[31].mxu1 }
 0x34c   : > { %v2172_v51 = vpop.f32.mrb[24].mxu0  ;;  %v2057_v52 = vmax.f32 %v2056_v49, 0.0 }
 0x34d   : > { %v3884_v53 = vpop.f32.mrb[25].mxu0 }
 0x34e   : > { %v2175_v44 = vpop.f32.mrb[26].mxu0  ;;  %v2182_v56 = vrot.slane %v2057_v52, 1 }
 0x34f   : > { %v2117_v46 = vpop.f32.mrb[32].mxu1  ;;  %v3885_v48 = vpop.f32.mrb[27].mxu0 }
 0x350   : > { %v2173_v54 = vadd.f32 %v2172_v51, %v2117_v46  ;;  %v3876_v55 = vpop.f32.mrb[33].mxu1  ;;  %v2183_v61 = vsel %vm2058_vm6, 0.0, %v2182_v56  ;;  %v5006_v46 = vrot.slane %v337_v36, %v2583_v45 }
 0x351   : > { %v2120_v57 = vpop.f32.mrb[34].mxu1  ;;  %v2595_v55 = vsub.s32 4, %v4420_v62 }
 0x352   : > { %v2178_v58 = vadd.f32 %v3462_v40, %v2173_v54  ;;  %v3877_v59 = vpop.f32.mrb[35].mxu1 }
 0x354   : > { %v2179_v60 = vmax.f32 %v2178_v58, 0.0 }
 0x356   : > { %v2180_v63 = vrot.slane %v2179_v60, 7  ;;  %v4850_v0 = vpack.c.bf16 %v2179_v60, %v2057_v52  ;;  %v4852_v1 = vpack.c.bf16 %v2183_v61, %v2179_v60 }
 0x358   : > { %v2181_v2 = vsel %vm363_vm1, 0.0, %v2180_v63 }
 0x359   : > { %v2211_v5 = vpack.c.bf16 %v2057_v52, %v2181_v2  ;;  %v5003_v52 = vrot.slane %v337_v36, %v2579_v42 }
 0x35b   : > { %3507 = vmatmul.mubr.msk.bf16.vlgmr.msra.gmra.mrb[36].mxu1 %vm1757_vm5, %v2211_v5  ;;  %3508 = vmatmul.mubr.msk.bf16.vlgmr.msra.gmra.mrb[28].mxu0 %vm1757_vm5, %v2211_v5 }
 0x35c   : > { %2493 = vmatpush1.bf16.msra.mxu0 %v4093_v3  ;;  %3887 = vmatpush3.bf16.msra.mxu1 %v4096_v4 }
 0x35d   : > { %3888 = vmatprep.subr.bf16.mxu1 %v4185_v39  ;;  %2494 = vmatprep.subr.bf16.mxu0 %v4100_v6 }
 0x35e   : > { %3890 = vmatprep.mubr.msk.bf16.mxu1 %vm4186_vm0, %v4185_v39  ;;  %2524 = vmatprep.mubr.bf16.mxu0 %v4188_v35 }
 0x360   : > { %3889 = vmatpush3.bf16.msra.mxu1 %v4097_v7  ;;  %2495 = vmatpush1.bf16.msra.mxu0 %v4098_v8 }
 0x361   : > { %2449 = vmatprep.subr.bf16.mxu1 %v4103_v9  ;;  %3894 = vmatprep.subr.bf16.mxu0 %v4185_v39 }
 0x363   : > { %3891 = vmatmul.mubr.msk.bf16.vlgmr.msra.gmra.mrb[40].mxu1 %vm1757_vm5, %v2211_v5 }
 0x364   : > { %2450 = vmatpush1.bf16.msra.mxu1 %v4101_v10  ;;  %2481 = vmatprep.mubr.bf16.mxu1 %v4188_v35 }
 0x365   : > { %2451 = vmatprep.subr.bf16.mxu1 %v4106_v11 }
 0x367   : > { %3521 = vmatmul.mubr.msk.bf16.vlgmr.msra.gmra.mrb[28].mxu0 %vm1757_vm5, %v4850_v0 }
 0x368   : > { %3895 = vmatpush3.bf16.msra.mxu0 %v4107_v14  ;;  %2452 = vmatpush1.bf16.msra.mxu1 %v4104_v12 }
 0x369   : > { %3896 = vmatprep.subr.bf16.mxu0 %v4185_v39  ;;  %2700 = vmatprep.subr.bf16.mxu1 %v4111_v16 }
 0x36a   : > { %3898 = vmatprep.mubr.msk.bf16.mxu0 %vm4186_vm0, %v4185_v39 }
 0x36b   : > { %3520 = vmatmul.mubr.msk.bf16.vlgmr.msra.gmra.mrb[36].mxu1 %vm1757_vm5, %v4850_v0 }
 0x36c   : > { %3897 = vmatpush3.bf16.msra.mxu0 %v4108_v17  ;;  %2701 = vmatpush1.bf16.msra.mxu1 %v4109_v18 }
 0x36d   : > { %2743 = vmatprep.subr.bf16.mxu0 %v4114_v19  ;;  %2702 = vmatprep.subr.bf16.mxu1 %v4117_v20 }
 0x36e   : > { %2732 = vmatprep.mubr.bf16.mxu1 %v4188_v35 }
 0x36f   : > { %3899 = vmatmul.mubr.msk.bf16.vlgmr.msra.gmra.mrb[32].mxu0 %vm1757_vm5, %v4850_v0 }
 0x370   : > { %2744 = vmatpush1.bf16.msra.mxu0 %v4112_v21  ;;  %2703 = vmatpush1.bf16.msra.mxu1 %v4115_v22 }
 0x371   : > { %2745 = vmatprep.subr.bf16.mxu0 %v4120_v23  ;;  %3902 = vmatprep.subr.bf16.mxu1 %v4185_v39 }
 0x372   : > { %2775 = vmatprep.mubr.bf16.mxu0 %v4188_v35 }
 0x373   : > { %3545 = vmatmul.mubr.msk.bf16.vlgmr.msra.gmra.mrb[44].mxu1 %vm1757_vm5, %v4850_v0 }
 0x374   : > { %2746 = vmatpush1.bf16.msra.mxu0 %v4118_v24  ;;  %3903 = vmatpush3.bf16.msra.mxu1 %v4121_v25 }
 0x375   : > { %2925 = vmatprep.subr.bf16.mxu0 %v4124_v26  ;;  %3904 = vmatprep.subr.bf16.mxu1 %v4185_v39 }
 0x376   : > { %3906 = vmatprep.mubr.msk.bf16.mxu1 %vm4186_vm0, %v4185_v39 }
 0x377   : > { %3546 = vmatmul.mubr.msk.bf16.vlgmr.msra.gmra.mrb[36].mxu0 %vm1757_vm5, %v4850_v0 }
 0x378   : > { %2926 = vmatpush1.bf16.msra.mxu0 %v4122_v27  ;;  %3905 = vmatpush3.bf16.msra.mxu1 %v4125_v28 }
 0x379   : > { %2882 = vmatprep.subr.bf16.mxu1 %v4128_v29  ;;  %2927 = vmatprep.subr.bf16.mxu0 %v4131_v30 }
 0x37a   : > { %2957 = vmatprep.mubr.bf16.mxu0 %v4188_v35 }
 0x37b   : > { %3907 = vmatmul.mubr.msk.bf16.vlgmr.msra.gmra.mrb[48].mxu1 %vm1757_vm5, %v4850_v0 }
 0x37c   : > { %2883 = vmatpush1.bf16.msra.mxu1 %v4126_v31  ;;  %2928 = vmatpush1.bf16.msra.mxu0 %v4129_v32 }
 0x37d   : > { %2884 = vmatprep.subr.bf16.mxu1 %v4134_v33  ;;  %2914 = vmatprep.mubr.bf16.mxu1 %v4188_v35  ;;  %v2587_v35 = vsub.s32 2, %v4420_v62 }
 0x37e   : > { %3910 = vmatprep.subr.bf16.mxu0 %v4185_v39 }
 0x37f   : > { %v4996_v41 = vrot.slane %v337_v36, %v2587_v35 }
 0x380   : > { %2885 = vmatpush1.bf16.msra.mxu1 %v4132_v13 }
 0x383   : > { %3558 = vmatmul.mubr.msk.bf16.vlgmr.msra.gmra.mrb[44].mxu1 %vm1757_vm5, %v4852_v1  ;;  %3559 = vmatmul.mubr.msk.bf16.vlgmr.msra.gmra.mrb[36].mxu0 %vm1757_vm5, %v4852_v1 }
 0x384   : > { %3911 = vmatpush3.bf16.msra.mxu0 %v4135_v15  ;;  %3914 = vmatprep.mubr.msk.bf16.mxu0 %vm4186_vm0, %v4185_v39 }
 0x385   : > { %3912 = vmatprep.subr.bf16.mxu0 %v4185_v39  ;;  %v4999_v39 = vrot.slane %v337_v36, %v2591_v37 }
 0x388   : > { %3913 = vmatpush3.bf16.msra.mxu0 %v4136_v34 }
 0x38b   : > { %3915 = vmatmul.mubr.msk.bf16.vlgmr.msra.gmra.mrb[40].mxu0 %vm1757_vm5, %v4852_v1  ;;  %v5014_v1 = vrot.slane %v337_v36, %v2595_v55 }
 0x436   : > { %v2387_v38 = vpop.f32.mrb[40].mxu1 }
 0x437   : > { %v3892_v40 = vpop.f32.mrb[41].mxu1 }
 0x438   : > { %v2390_v43 = vpop.f32.mrb[42].mxu1 }
 0x439   : > { %v3893_v47 = vpop.f32.mrb[43].mxu1 }
 0x43a   : > { %v2526_v49 = vpop.f32.mrb[28].mxu0 }
 0x43b   : > { %v2604_v50 = vadd.f32 %v4996_v41, %v2526_v49  ;;  %v2528_v51 = vpop.f32.mrb[29].mxu0 }
 0x43c   : > { %v2605_v53 = vadd.f32 %v4999_v39, %v2528_v51  ;;  %v2530_v44 = vpop.f32.mrb[30].mxu0 }
 0x43d   : > { %4137 = vtanh.f32 %v2604_v50  ;;  %v2609_v48 = vadd.f32 %v4996_v41, %v2530_v44  ;;  %v2532_v54 = vpop.f32.mrb[31].mxu0 }
 0x43e   : > { %4139 = vtanh.f32 %v2605_v53  ;;  %v2610_v56 = vadd.f32 %v4999_v39, %v2532_v54  ;;  %v2483_v57 = vpop.f32.mrb[36].mxu1 }
 0x43f   : > { %4141 = vtanh.f32 %v2609_v48  ;;  %v2602_v58 = vadd.f32 %v5003_v52, %v2483_v57  ;;  %v2485_v59 = vpop.f32.mrb[37].mxu1 }
 0x440   : > { %4143 = vtanh.f32 %v2610_v56  ;;  %v2603_v60 = vadd.f32 %v5006_v46, %v2485_v59  ;;  %v2487_v61 = vpop.f32.mrb[38].mxu1 }
 0x441   : > { %4145 = vtanh.f32 %v2602_v58  ;;  %v2607_v63 = vadd.f32 %v5003_v52, %v2487_v61  ;;  %v2489_v0 = vpop.f32.mrb[39].mxu1 }
 0x442   : > { %4147 = vtanh.f32 %v2603_v60  ;;  %v2608_v62 = vadd.f32 %v5006_v46, %v2489_v0  ;;  %v2569_v2 = vpop.f32.mrb[32].mxu0 }
 0x443   : > { %4149 = vtanh.f32 %v2607_v63  ;;  %v2570_v3 = vadd.f32 %v2569_v2, %v2387_v38  ;;  %v3900_v4 = vpop.f32.mrb[33].mxu0 }
 0x444   : > { %4151 = vtanh.f32 %v2608_v62  ;;  %v2572_v5 = vpop.f32.mrb[34].mxu0 }
 0x445   : > { %v2606_v6 = vadd.f32 %v5014_v1, %v2570_v3  ;;  %v2573_v7 = vadd.f32 %v2572_v5, %v2390_v43  ;;  %v3901_v8 = vpop.f32.mrb[35].mxu0 }
 0x447   : > { %v4138_v9 = vpop.eup %4137  ;;  %4153 = vtanh.f32 %v2606_v6  ;;  %v2611_v10 = vadd.f32 %v5014_v1, %v2573_v7 }
 0x448   : > { %v4140_v11 = vpop.eup %4139  ;;  %3031 = vst [vmem:[%s5022_s15 + $0x10] sm:$0xff] %v4138_v9 }
 0x449   : > { %v4142_v12 = vpop.eup %4141  ;;  %3032 = vst [vmem:[%s5022_s15 + $0x18] sm:$0xff] %v4140_v11  ;;  %4155 = vtanh.f32 %v2611_v10 }
 0x44a   : > { %v4144_v14 = vpop.eup %4143  ;;  %3568 = vst [vmem:[%s5022_s15 + $0x60] sm:$0xff] %v4142_v12 }
 0x44b   : > { %v4146_v16 = vpop.eup %4145  ;;  %3569 = vst [vmem:[%s5022_s15 + $0x68] sm:$0xff] %v4144_v14 }
 0x44c   : > { %v4148_v17 = vpop.eup %4147  ;;  %3029 = vst [vmem:[%s5022_s15] sm:$0xff] %v4146_v16 }
 0x44d   : > { %v4150_v18 = vpop.eup %4149  ;;  %3030 = vst [vmem:[%s5022_s15 + $0x8] sm:$0xff] %v4148_v17 }
 0x44e   : > { %v4152_v19 = vpop.eup %4151  ;;  %3566 = vst [vmem:[%s5022_s15 + $0x50] sm:$0xff] %v4150_v18  ;;  %v2820_v20 = vpop.f32.mrb[48].mxu1 }
 0x44f   : > { %3567 = vst [vmem:[%s5022_s15 + $0x58] sm:$0xff] %v4152_v19  ;;  %v3908_v21 = vpop.f32.mrb[49].mxu1 }
 0x450   : > { %v2823_v22 = vpop.f32.mrb[50].mxu1 }
 0x451   : > { %v4154_v23 = vpop.eup %4153  ;;  %v3909_v24 = vpop.f32.mrb[51].mxu1 }
 0x452   : > { %3033 = vst [vmem:[%s5022_s15 + $0x20] sm:$0xff] %v4154_v23 }
 0x453   : > { %v4156_v25 = vpop.eup %4155 }
 0x454   : > { %3570 = vst [vmem:[%s5022_s15 + $0x70] sm:$0xff] %v4156_v25 }
 0x456   : > { %v2916_v26 = vpop.f32.mrb[44].mxu1  ;;  %v2959_v27 = vpop.f32.mrb[36].mxu0 }
 0x457   : > { %v3009_v28 = vadd.f32 %v2916_v26, %v5003_v52  ;;  %v3011_v29 = vadd.f32 %v2959_v27, %v4996_v41  ;;  %v2918_v30 = vpop.f32.mrb[45].mxu1  ;;  %v2961_v31 = vpop.f32.mrb[37].mxu0 }
 0x458   : > { %v3010_v32 = vadd.f32 %v2918_v30, %v5006_v46  ;;  %v3012_v33 = vadd.f32 %v2961_v31, %v4999_v39  ;;  %v2920_v13 = vpop.f32.mrb[46].mxu1  ;;  %v2963_v15 = vpop.f32.mrb[38].mxu0 }
 0x459   : > { %4157 = vtanh.f32 %v3009_v28  ;;  %v3014_v34 = vadd.f32 %v2920_v13, %v5003_v52  ;;  %v2922_v35 = vpop.f32.mrb[47].mxu1  ;;  %v2965_v36 = vpop.f32.mrb[39].mxu0  ;;  %v3016_v37 = vadd.f32 %v2963_v15, %v4996_v41 }
 0x45a   : > { %4159 = vtanh.f32 %v3011_v29  ;;  %v3015_v38 = vadd.f32 %v2922_v35, %v5006_v46  ;;  %v3017_v40 = vadd.f32 %v2965_v36, %v4999_v39 }
 0x45b   : > { %4161 = vtanh.f32 %v3010_v32 }
 0x45c   : > { %4163 = vtanh.f32 %v3012_v33 }
 0x45d   : > { %4165 = vtanh.f32 %v3014_v34 }
 0x45e   : > { %4167 = vtanh.f32 %v3016_v37  ;;  %v3002_v42 = vpop.f32.mrb[40].mxu0 }
 0x45f   : > { %4169 = vtanh.f32 %v3015_v38  ;;  %v3003_v43 = vadd.f32 %v3002_v42, %v2820_v20  ;;  %v3916_v45 = vpop.f32.mrb[41].mxu0 }
 0x460   : > { %4171 = vtanh.f32 %v3017_v40  ;;  %v3005_v47 = vpop.f32.mrb[42].mxu0 }
 0x461   : > { %v3013_v41 = vadd.f32 %v3003_v43, %v5014_v1  ;;  %v3006_v49 = vadd.f32 %v3005_v47, %v2823_v22  ;;  %v3917_v50 = vpop.f32.mrb[43].mxu0 }
 0x463   : > { %v4158_v51 = vpop.eup %4157  ;;  %4173 = vtanh.f32 %v3013_v41  ;;  %v3018_v39 = vadd.f32 %v3006_v49, %v5014_v1 }
 0x464   : > { %v4160_v52 = vpop.eup %4159  ;;  %3561 = vst [vmem:[%s5022_s15 + $0x28] sm:$0xff] %v4158_v51 }
 0x465   : > { %v4162_v53 = vpop.eup %4161  ;;  %3563 = vst [vmem:[%s5022_s15 + $0x38] sm:$0xff] %v4160_v52  ;;  %4175 = vtanh.f32 %v3018_v39 }
 0x466   : > { %v4164_v44 = vpop.eup %4163  ;;  %3562 = vst [vmem:[%s5022_s15 + $0x30] sm:$0xff] %v4162_v53 }
 0x467   : > { %v4166_v46 = vpop.eup %4165  ;;  %3564 = vst [vmem:[%s5022_s15 + $0x40] sm:$0xff] %v4164_v44 }
 0x468   : > { %v4168_v48 = vpop.eup %4167  ;;  %3571 = vst [vmem:[%s5022_s15 + $0x78] sm:$0xff] %v4166_v46 }
 0x469   : > { %v4170_v54 = vpop.eup %4169  ;;  %3573 = vst [vmem:[%s5022_s15 + $0x88] sm:$0xff] %v4168_v48 }
 0x46a   : > { %v4172_v55 = vpop.eup %4171  ;;  %3572 = vst [vmem:[%s5022_s15 + $0x80] sm:$0xff] %v4170_v54 }
 0x46b   : > { %3574 = vst [vmem:[%s5022_s15 + $0x90] sm:$0xff] %v4172_v55 }
 0x46d   : > { %v4174_v56 = vpop.eup %4173 }
 0x46e   : > { %3565 = vst [vmem:[%s5022_s15 + $0x48] sm:$0xff] %v4174_v56 }
 0x46f   : > { %v4176_v57 = vpop.eup %4175 }
 0x470   : > { %3575 = vst [vmem:[%s5022_s15 + $0x98] sm:$0xff] %v4176_v57 }
 0x471 PF: > { %s19_s30 = sadd.s32 1, %s4183_s30  }
 0x472   : > { %p16_p4 = scmp.ge.s32.totalorder %s19_s30, 4  }
 0x474   :  { %18 = sbr.rel (!%p16_p4) target bundleno = 1 (0x1), region = 102 }

</bundles_post_ra>
